<compile_context>
chip_gen: v6e
topology: v6e:2x2x1
jax: 0.10.0
libtpu: 0.0.40
codegen_flags: <defaults>
</compile_context>

<pallas_src>
import jax
import jax.numpy as jnp
from jax.experimental import pallas as pl
from jax.experimental.pallas import tpu as pltpu


def head_kernel(x_ref, wcat_ref, ba1_ref, wa2_ref, ba2_ref, bc1_ref,
                wc2_ref, bc2_ref, o_ref):
    bt, hw, ch = x_ref.shape
    hidden = ba1_ref.shape[1]

    # --- base_model.avgpool + torch.flatten(features, 1) --------------------
    # Chunked f32 accumulation over the spatial (sublane) axis: the live
    # intermediate is [bt, C] f32 + one [bt, 8, C] slice, never [bt, HW, C] f32.
    chunk = 8
    n_full = hw // chunk
    acc = jnp.zeros((bt, ch), jnp.float32)
    for k in range(n_full):                       # static slices = free views
        acc = acc + jnp.sum(
            x_ref[:, k * chunk:(k + 1) * chunk, :].astype(jnp.float32), axis=1)
    if hw - n_full * chunk:                       # ragged spatial tail
        acc = acc + jnp.sum(
            x_ref[:, n_full * chunk:, :].astype(jnp.float32), axis=1)
    feat_bf = (acc * (1.0 / hw)).astype(jnp.bfloat16)          # [bt, C]

    # --- fused (attention.fc[0] | classifier[1]) matmul: C -> 2*hidden ------
    z = jnp.dot(feat_bf, wcat_ref[...],
                preferred_element_type=jnp.float32)            # [bt, 2*hidden]

    # --- attention.fc: ReLU -> Linear(512, 1) -> Sigmoid --------------------
    h = jnp.maximum(z[:, :hidden] + ba1_ref[...], 0.0)         # [bt, hidden]
    # N=1 projection on VPU (multiply) + XLU (row-sum) instead of the MXU.
    a = jnp.sum(h * wa2_ref[...], axis=-1, keepdims=True) + ba2_ref[...]
    att = jax.nn.sigmoid(a)                                    # [bt, 1]

    # --- classifier: (feat * att) @ W_cls1 == att * (feat @ W_cls1) ---------
    c = jnp.maximum(att * z[:, hidden:] + bc1_ref[...], 0.0)   # [bt, hidden]
    o_ref[...] = (jnp.dot(c.astype(jnp.bfloat16), wc2_ref[...],
                          preferred_element_type=jnp.float32)
                  + bc2_ref[...])                              # [bt, NC_pad]


def _pick_batch_tile(B, HW, C, hidden, nc_pad, vmem_budget):
    """Largest batch tile (<=128, multiple of 8) whose double-buffered x block
    plus resident weights and live intermediates fit the VMEM budget, while
    keeping >= 2 grid tiles so both v7x TensorCores are occupied."""
    if B <= 8:
        return B
    w_bytes = 2 * (C * 2 * hidden * 2            # wcat bf16 (double-buffered)
                   + hidden * nc_pad * 2         # wc2 bf16
                   + (3 * hidden + 2 * nc_pad + 1) * 4)   # biases / wa2 f32

    def fits(bt):
        x_bytes = 2 * bt * HW * C * 2            # double-buffered bf16 x block
        out_bytes = 2 * bt * nc_pad * 4          # double-buffered f32 out block
        live = bt * C * 4 + bt * 2 * hidden * 4  # pooled acc + z intermediate
        return w_bytes + x_bytes + out_bytes + live <= vmem_budget

    bt = 128
    while bt > 8 and not fits(bt):
        bt //= 2
    while bt > 8 and pl.cdiv(B, bt) < 2:         # keep both v7x TCs busy
        bt //= 2
    return bt


def dog_breed_head(feats, params, num_classes, *, batch_tile=None,
                   vmem_budget_bytes=48 * 1024 * 1024):
    """feats: [B, H, W, C] (or [B, HW, C]) backbone feature maps (ideally bf16
    NHWC straight from the backbone).  Returns [B, num_classes] f32 logits."""
    wcat, ba1, wa2, ba2, bc1, wc2, bc2 = params
    hidden = ba1.shape[1]
    nc_pad = wc2.shape[1]                        # lane-padded multiple of 128

    if feats.ndim == 4:
        B, H, W, C = feats.shape
        x = feats.reshape(B, H * W, C)           # free metadata reshape (NHWC)
    else:
        x = feats
        B, _, C = x.shape
    HW = x.shape[1]
    x = x.astype(jnp.bfloat16)                   # no-op if backbone emits bf16

    bt = batch_tile or _pick_batch_tile(B, HW, C, hidden, nc_pad,
                                        vmem_budget_bytes)
    grid = (pl.cdiv(B, bt),)                     # no batch padding: ragged tail
                                                 # rows are discarded by out[:B]

    def resident(shape):
        # Whole-array VMEM block, same block index every step => loaded once.
        # (pipeline_mode=pl.Buffered(1) could halve its VMEM footprint on v7x.)
        n = len(shape)
        return pl.BlockSpec(shape, lambda i, _n=n: (0,) * _n)

    out = pl.pallas_call(
        head_kernel,
        out_shape=jax.ShapeDtypeStruct((B, nc_pad), jnp.float32),
        grid_spec=pl.GridSpec(
            grid=grid,
            in_specs=[
                pl.BlockSpec((bt, HW, C), lambda i: (i, 0, 0)),  # streamed x
                resident(wcat.shape),            # [C, 2*hidden] bf16
                resident(ba1.shape),             # [1, hidden]   f32
                resident(wa2.shape),             # [1, hidden]   f32
                resident(ba2.shape),             # [1, 1]        f32
                resident(bc1.shape),             # [1, hidden]   f32
                resident(wc2.shape),             # [hidden, NCp] bf16
                resident(bc2.shape),             # [1, NCp]      f32
            ],
            out_specs=pl.BlockSpec((bt, nc_pad), lambda i: (i, 0)),
        ),
        compiler_params=pltpu.CompilerParams(
            dimension_semantics=("parallel",),   # shard batch tiles across TCs
            vmem_limit_bytes=vmem_budget_bytes + (8 << 20),
        ),
    )(x, wcat, ba1, wa2, ba2, bc1, wc2, bc2)

    return out[:B, :num_classes]


def xavier_uniform(key, out_f, in_f):
    # Matches DogBreedClassifier.init_weights: xavier_uniform weight, zero bias.
    limit = (6.0 / (in_f + out_f)) ** 0.5
    return jax.random.uniform(key, (out_f, in_f), jnp.float32, -limit, limit)


def make_params(key, num_features, hidden, num_classes):
    k1, k2, k3, k4 = jax.random.split(key, 4)
    # PyTorch-convention [out, in] weights.
    w_att1 = xavier_uniform(k1, hidden, num_features)      # Linear(C, 512)
    w_att2 = xavier_uniform(k2, 1, hidden)                  # Linear(512, 1)
    w_cls1 = xavier_uniform(k3, hidden, num_features)       # Linear(C, 512)
    w_cls2 = xavier_uniform(k4, num_classes, hidden)        # Linear(512, NC)

    # Fuse the two C->512 weights into one [C, 2*hidden] bf16 matrix.
    wcat = jnp.concatenate([w_att1.T, w_cls1.T], axis=1).astype(jnp.bfloat16)
    # Lane-pad num_classes to a multiple of 128 for an unmasked N tile / store.
    nc_pad = pl.cdiv(num_classes, 128) * 128
    wc2 = jnp.zeros((hidden, nc_pad), jnp.float32).at[:, :num_classes] \
             .set(w_cls2.T).astype(jnp.bfloat16)
    return (
        wcat,
        jnp.zeros((1, hidden), jnp.float32),       # attention.fc[0] bias
        w_att2.astype(jnp.float32),                # attention.fc[2] weight [1, 512]
        jnp.zeros((1, 1), jnp.float32),            # attention.fc[2] bias
        jnp.zeros((1, hidden), jnp.float32),       # classifier[1] bias
        wc2,                                       # classifier[4] weight [512, NCp]
        jnp.zeros((1, nc_pad), jnp.float32),       # classifier[4] bias (padded)
    )


def ref_head(feats, params, num_classes):
    """Pure-JAX reference emulating the kernel's bf16 numerics."""
    wcat, ba1, wa2, ba2, bc1, wc2, bc2 = params
    hidden = ba1.shape[1]
    B = feats.shape[0]
    C = feats.shape[-1]
    x = feats.reshape(B, -1, C).astype(jnp.bfloat16).astype(jnp.float32)
    feat = jnp.mean(x, axis=1)
    feat_bf = feat.astype(jnp.bfloat16).astype(jnp.float32)
    z = feat_bf @ wcat.astype(jnp.float32)
    h = jnp.maximum(z[:, :hidden] + ba1, 0.0)
    att = jax.nn.sigmoid(jnp.sum(h * wa2, axis=-1, keepdims=True) + ba2)
    c = jnp.maximum(att * z[:, hidden:] + bc1, 0.0)
    out = c.astype(jnp.bfloat16).astype(jnp.float32) @ wc2.astype(jnp.float32) + bc2
    return out[:, :num_classes]


if __name__ == "__main__":
    B, H, W, C = 16, 8, 8, 256        # C stands in for num_features (1792 in B4)
    HIDDEN = 512                      # must stay a multiple of 128 (it is: 512)
    NUM_CLASSES = 16

    key = jax.random.PRNGKey(0)
    kx, kp = jax.random.split(key)
    # Backbone feature maps, already bf16 NHWC (no wrapper layout pass needed).
    feats = jax.random.normal(kx, (B, H, W, C), jnp.float32).astype(jnp.bfloat16)
    params = make_params(kp, C, HIDDEN, NUM_CLASSES)

    out = dog_breed_head(feats, params, NUM_CLASSES)
    jax.block_until_ready(out)
    assert out.shape == (B, NUM_CLASSES)

    ref = ref_head(feats, params, NUM_CLASSES)
    assert jnp.allclose(out, ref, rtol=5e-2, atol=5e-2), \
        float(jnp.max(jnp.abs(out - ref)))
    print("KERNEL_OK")
</pallas_src>

<mosaic_0001>
module attributes {stable_mosaic.version = 11 : i64} {
  func.func @head_kernel(%arg0: i32, %arg1: memref<8x64x256xbf16, #tpu.memory_space<vmem>>, %arg2: memref<256x1024xbf16, #tpu.memory_space<vmem>>, %arg3: memref<1x512xf32, #tpu.memory_space<vmem>>, %arg4: memref<1x512xf32, #tpu.memory_space<vmem>>, %arg5: memref<1x1xf32, #tpu.memory_space<vmem>>, %arg6: memref<1x512xf32, #tpu.memory_space<vmem>>, %arg7: memref<512x128xbf16, #tpu.memory_space<vmem>>, %arg8: memref<1x128xf32, #tpu.memory_space<vmem>>, %arg9: memref<8x128xf32, #tpu.memory_space<vmem>>) attributes {dimension_semantics = [#tpu.dimension_semantics<parallel>], iteration_bounds = array<i64: 2>, scalar_prefetch = 0 : i64, scratch_operands = 0 : i64, tpu.core_type = #tpu.core_type<tc>, window_params = [{transform_indices = @transform_0, window_bounds = array<i64: 8, 64, 256>}, {pipeline_mode = #tpu.pipeline_mode<synchronous>, transform_indices = @transform_1, window_bounds = array<i64: 256, 1024>}, {pipeline_mode = #tpu.pipeline_mode<synchronous>, transform_indices = @transform_2, window_bounds = array<i64: 1, 512>}, {pipeline_mode = #tpu.pipeline_mode<synchronous>, transform_indices = @transform_3, window_bounds = array<i64: 1, 512>}, {pipeline_mode = #tpu.pipeline_mode<synchronous>, transform_indices = @transform_4, window_bounds = array<i64: 1, 1>}, {pipeline_mode = #tpu.pipeline_mode<synchronous>, transform_indices = @transform_5, window_bounds = array<i64: 1, 512>}, {pipeline_mode = #tpu.pipeline_mode<synchronous>, transform_indices = @transform_6, window_bounds = array<i64: 512, 128>}, {pipeline_mode = #tpu.pipeline_mode<synchronous>, transform_indices = @transform_7, window_bounds = array<i64: 1, 128>}, {transform_indices = @transform_8, window_bounds = array<i64: 8, 128>}]} {
    %cst = arith.constant 0.000000e+00 : f32
    %0 = vector.broadcast %cst : f32 to vector<8x256xf32>
    %c0 = arith.constant 0 : index
    %c0_0 = arith.constant 0 : index
    %c0_1 = arith.constant 0 : index
    %1 = vector.load %arg1[%c0, %c0_0, %c0_1] : memref<8x64x256xbf16, #tpu.memory_space<vmem>>, vector<8x8x256xbf16>
    %2 = arith.extf %1 : vector<8x8x256xbf16> to vector<8x8x256xf32>
    %cst_2 = arith.constant dense<0.000000e+00> : vector<8x256xf32>
    %3 = vector.multi_reduction <add>, %2, %cst_2 [1] : vector<8x8x256xf32> to vector<8x256xf32>
    %4 = arith.addf %0, %3 : vector<8x256xf32>
    %c0_3 = arith.constant 0 : index
    %c8 = arith.constant 8 : index
    %c0_4 = arith.constant 0 : index
    %5 = vector.load %arg1[%c0_3, %c8, %c0_4] : memref<8x64x256xbf16, #tpu.memory_space<vmem>>, vector<8x8x256xbf16>
    %6 = arith.extf %5 : vector<8x8x256xbf16> to vector<8x8x256xf32>
    %cst_5 = arith.constant dense<0.000000e+00> : vector<8x256xf32>
    %7 = vector.multi_reduction <add>, %6, %cst_5 [1] : vector<8x8x256xf32> to vector<8x256xf32>
    %8 = arith.addf %4, %7 : vector<8x256xf32>
    %c0_6 = arith.constant 0 : index
    %c16 = arith.constant 16 : index
    %c0_7 = arith.constant 0 : index
    %9 = vector.load %arg1[%c0_6, %c16, %c0_7] : memref<8x64x256xbf16, #tpu.memory_space<vmem>>, vector<8x8x256xbf16>
    %10 = arith.extf %9 : vector<8x8x256xbf16> to vector<8x8x256xf32>
    %cst_8 = arith.constant dense<0.000000e+00> : vector<8x256xf32>
    %11 = vector.multi_reduction <add>, %10, %cst_8 [1] : vector<8x8x256xf32> to vector<8x256xf32>
    %12 = arith.addf %8, %11 : vector<8x256xf32>
    %c0_9 = arith.constant 0 : index
    %c24 = arith.constant 24 : index
    %c0_10 = arith.constant 0 : index
    %13 = vector.load %arg1[%c0_9, %c24, %c0_10] : memref<8x64x256xbf16, #tpu.memory_space<vmem>>, vector<8x8x256xbf16>
    %14 = arith.extf %13 : vector<8x8x256xbf16> to vector<8x8x256xf32>
    %cst_11 = arith.constant dense<0.000000e+00> : vector<8x256xf32>
    %15 = vector.multi_reduction <add>, %14, %cst_11 [1] : vector<8x8x256xf32> to vector<8x256xf32>
    %16 = arith.addf %12, %15 : vector<8x256xf32>
    %c0_12 = arith.constant 0 : index
    %c32 = arith.constant 32 : index
    %c0_13 = arith.constant 0 : index
    %17 = vector.load %arg1[%c0_12, %c32, %c0_13] : memref<8x64x256xbf16, #tpu.memory_space<vmem>>, vector<8x8x256xbf16>
    %18 = arith.extf %17 : vector<8x8x256xbf16> to vector<8x8x256xf32>
    %cst_14 = arith.constant dense<0.000000e+00> : vector<8x256xf32>
    %19 = vector.multi_reduction <add>, %18, %cst_14 [1] : vector<8x8x256xf32> to vector<8x256xf32>
    %20 = arith.addf %16, %19 : vector<8x256xf32>
    %c0_15 = arith.constant 0 : index
    %c40 = arith.constant 40 : index
    %c0_16 = arith.constant 0 : index
    %21 = vector.load %arg1[%c0_15, %c40, %c0_16] : memref<8x64x256xbf16, #tpu.memory_space<vmem>>, vector<8x8x256xbf16>
    %22 = arith.extf %21 : vector<8x8x256xbf16> to vector<8x8x256xf32>
    %cst_17 = arith.constant dense<0.000000e+00> : vector<8x256xf32>
    %23 = vector.multi_reduction <add>, %22, %cst_17 [1] : vector<8x8x256xf32> to vector<8x256xf32>
    %24 = arith.addf %20, %23 : vector<8x256xf32>
    %c0_18 = arith.constant 0 : index
    %c48 = arith.constant 48 : index
    %c0_19 = arith.constant 0 : index
    %25 = vector.load %arg1[%c0_18, %c48, %c0_19] : memref<8x64x256xbf16, #tpu.memory_space<vmem>>, vector<8x8x256xbf16>
    %26 = arith.extf %25 : vector<8x8x256xbf16> to vector<8x8x256xf32>
    %cst_20 = arith.constant dense<0.000000e+00> : vector<8x256xf32>
    %27 = vector.multi_reduction <add>, %26, %cst_20 [1] : vector<8x8x256xf32> to vector<8x256xf32>
    %28 = arith.addf %24, %27 : vector<8x256xf32>
    %c0_21 = arith.constant 0 : index
    %c56 = arith.constant 56 : index
    %c0_22 = arith.constant 0 : index
    %29 = vector.load %arg1[%c0_21, %c56, %c0_22] : memref<8x64x256xbf16, #tpu.memory_space<vmem>>, vector<8x8x256xbf16>
    %30 = arith.extf %29 : vector<8x8x256xbf16> to vector<8x8x256xf32>
    %cst_23 = arith.constant dense<0.000000e+00> : vector<8x256xf32>
    %31 = vector.multi_reduction <add>, %30, %cst_23 [1] : vector<8x8x256xf32> to vector<8x256xf32>
    %32 = arith.addf %28, %31 : vector<8x256xf32>
    %cst_24 = arith.constant 1.562500e-02 : f32
    %33 = vector.broadcast %cst_24 : f32 to vector<8x256xf32>
    %34 = arith.mulf %32, %33 : vector<8x256xf32>
    %35 = arith.truncf %34 : vector<8x256xf32> to vector<8x256xbf16>
    %c0_25 = arith.constant 0 : index
    %c0_26 = arith.constant 0 : index
    %36 = vector.load %arg2[%c0_25, %c0_26] : memref<256x1024xbf16, #tpu.memory_space<vmem>>, vector<256x1024xbf16>
    %cst_27 = arith.constant dense<0.000000e+00> : vector<8x1024xf32>
    %37 = tpu.matmul %35, %36, %cst_27 {dimension_numbers = #tpu.dot_dimension_numbers<[1], [0], [0], [1], [0, 0, 1, 1], [], []>} : vector<8x256xbf16>, vector<256x1024xbf16>, vector<8x1024xf32> -> vector<8x1024xf32>
    %38 = vector.extract_strided_slice %37 {offsets = [0, 0], sizes = [8, 512], strides = [1, 1]} : vector<8x1024xf32> to vector<8x512xf32>
    %c0_28 = arith.constant 0 : index
    %c0_29 = arith.constant 0 : index
    %39 = vector.load %arg3[%c0_28, %c0_29] : memref<1x512xf32, #tpu.memory_space<vmem>>, vector<1x512xf32>
    %40 = vector.broadcast %39 : vector<1x512xf32> to vector<8x512xf32>
    %41 = arith.addf %38, %40 : vector<8x512xf32>
    %cst_30 = arith.constant 0.000000e+00 : f32
    %42 = vector.broadcast %cst_30 : f32 to vector<8x512xf32>
    %43 = arith.maximumf %41, %42 : vector<8x512xf32>
    %c0_31 = arith.constant 0 : index
    %c0_32 = arith.constant 0 : index
    %44 = vector.load %arg4[%c0_31, %c0_32] : memref<1x512xf32, #tpu.memory_space<vmem>>, vector<1x512xf32>
    %45 = vector.broadcast %44 : vector<1x512xf32> to vector<8x512xf32>
    %46 = arith.mulf %43, %45 : vector<8x512xf32>
    %cst_33 = arith.constant dense<0.000000e+00> : vector<8xf32>
    %47 = vector.multi_reduction <add>, %46, %cst_33 [1] : vector<8x512xf32> to vector<8xf32>
    %48 = vector.shape_cast %47 : vector<8xf32> to vector<8x1xf32>
    %c0_34 = arith.constant 0 : index
    %c0_35 = arith.constant 0 : index
    %49 = vector.load %arg5[%c0_34, %c0_35] : memref<1x1xf32, #tpu.memory_space<vmem>>, vector<1x1xf32>
    %50 = vector.broadcast %49 : vector<1x1xf32> to vector<8x1xf32>
    %51 = arith.addf %48, %50 : vector<8x1xf32>
    %52 = arith.negf %51 : vector<8x1xf32>
    %53 = math.exp %52 : vector<8x1xf32>
    %cst_36 = arith.constant 1.000000e+00 : f32
    %54 = vector.broadcast %cst_36 : f32 to vector<8x1xf32>
    %55 = arith.addf %54, %53 : vector<8x1xf32>
    %56 = arith.divf %54, %55 : vector<8x1xf32>
    %57 = vector.extract_strided_slice %37 {offsets = [0, 512], sizes = [8, 512], strides = [1, 1]} : vector<8x1024xf32> to vector<8x512xf32>
    %58 = vector.broadcast %56 : vector<8x1xf32> to vector<8x512xf32>
    %59 = arith.mulf %58, %57 : vector<8x512xf32>
    %c0_37 = arith.constant 0 : index
    %c0_38 = arith.constant 0 : index
    %60 = vector.load %arg6[%c0_37, %c0_38] : memref<1x512xf32, #tpu.memory_space<vmem>>, vector<1x512xf32>
    %61 = vector.broadcast %60 : vector<1x512xf32> to vector<8x512xf32>
    %62 = arith.addf %59, %61 : vector<8x512xf32>
    %cst_39 = arith.constant 0.000000e+00 : f32
    %63 = vector.broadcast %cst_39 : f32 to vector<8x512xf32>
    %64 = arith.maximumf %62, %63 : vector<8x512xf32>
    %65 = arith.truncf %64 : vector<8x512xf32> to vector<8x512xbf16>
    %c0_40 = arith.constant 0 : index
    %c0_41 = arith.constant 0 : index
    %66 = vector.load %arg7[%c0_40, %c0_41] : memref<512x128xbf16, #tpu.memory_space<vmem>>, vector<512x128xbf16>
    %cst_42 = arith.constant dense<0.000000e+00> : vector<8x128xf32>
    %67 = tpu.matmul %65, %66, %cst_42 {dimension_numbers = #tpu.dot_dimension_numbers<[1], [0], [0], [1], [0, 0, 1, 1], [], []>} : vector<8x512xbf16>, vector<512x128xbf16>, vector<8x128xf32> -> vector<8x128xf32>
    %c0_43 = arith.constant 0 : index
    %c0_44 = arith.constant 0 : index
    %68 = vector.load %arg8[%c0_43, %c0_44] : memref<1x128xf32, #tpu.memory_space<vmem>>, vector<1x128xf32>
    %69 = vector.broadcast %68 : vector<1x128xf32> to vector<8x128xf32>
    %70 = arith.addf %67, %69 : vector<8x128xf32>
    %c0_45 = arith.constant 0 : index
    %c0_46 = arith.constant 0 : index
    %71 = vector.load %arg9[%c0_45, %c0_46] : memref<8x128xf32, #tpu.memory_space<vmem>>, vector<8x128xf32>
    tpu.vector_store %arg9[%c0_45, %c0_46], %70 {strides = array<i32>} : memref<8x128xf32, #tpu.memory_space<vmem>>, vector<8x128xf32>,
    return
  }
  func.func @transform_0(%arg0: i32) -> (i32, i32, i32) {
    %c0_i32 = arith.constant 0 : i32
    %c0_i32_0 = arith.constant 0 : i32
    %c0_i32_1 = arith.constant 0 : i32
    return %arg0, %c0_i32, %c0_i32_0 : i32, i32, i32
  }
  func.func @transform_1(%arg0: i32) -> (i32, i32) {
    %c0_i32 = arith.constant 0 : i32
    %c0_i32_0 = arith.constant 0 : i32
    %c0_i32_1 = arith.constant 0 : i32
    return %c0_i32, %c0_i32_0 : i32, i32
  }
  func.func @transform_2(%arg0: i32) -> (i32, i32) {
    %c0_i32 = arith.constant 0 : i32
    %c0_i32_0 = arith.constant 0 : i32
    %c0_i32_1 = arith.constant 0 : i32
    return %c0_i32, %c0_i32_0 : i32, i32
  }
  func.func @transform_3(%arg0: i32) -> (i32, i32) {
    %c0_i32 = arith.constant 0 : i32
    %c0_i32_0 = arith.constant 0 : i32
    %c0_i32_1 = arith.constant 0 : i32
    return %c0_i32, %c0_i32_0 : i32, i32
  }
  func.func @transform_4(%arg0: i32) -> (i32, i32) {
    %c0_i32 = arith.constant 0 : i32
    %c0_i32_0 = arith.constant 0 : i32
    %c0_i32_1 = arith.constant 0 : i32
    return %c0_i32, %c0_i32_0 : i32, i32
  }
  func.func @transform_5(%arg0: i32) -> (i32, i32) {
    %c0_i32 = arith.constant 0 : i32
    %c0_i32_0 = arith.constant 0 : i32
    %c0_i32_1 = arith.constant 0 : i32
    return %c0_i32, %c0_i32_0 : i32, i32
  }
  func.func @transform_6(%arg0: i32) -> (i32, i32) {
    %c0_i32 = arith.constant 0 : i32
    %c0_i32_0 = arith.constant 0 : i32
    %c0_i32_1 = arith.constant 0 : i32
    return %c0_i32, %c0_i32_0 : i32, i32
  }
  func.func @transform_7(%arg0: i32) -> (i32, i32) {
    %c0_i32 = arith.constant 0 : i32
    %c0_i32_0 = arith.constant 0 : i32
    %c0_i32_1 = arith.constant 0 : i32
    return %c0_i32, %c0_i32_0 : i32, i32
  }
  func.func @transform_8(%arg0: i32) -> (i32, i32) {
    %c0_i32 = arith.constant 0 : i32
    %c0_i32_0 = arith.constant 0 : i32
    return %arg0, %c0_i32 : i32, i32
  }
}

</mosaic_0001>

<bundles_post_ra>
// kernel: tpu_custom_call.1
= control target key start
LH: loop header
LB: loop body
LE: loop exit
PB: predicated region body
PF: predicated region fallthrough
CT: control target
= control target key end

     0   :  { %s4777_s0 = inlined_call_operand.hbm [shape: bf16[16,64,256], index: 0, kind: input, shape index: {}]   ;;  %s4778_s1 = inlined_call_operand.hbm [shape: bf16[256,1024], index: 1, kind: input, shape index: {}]   ;;  %s4779_s2 = inlined_call_operand.vmem [shape: f32[1,512], index: 2, kind: input, shape index: {}]   ;;  %s4780_s3 = inlined_call_operand.hbm [shape: f32[1,512], index: 3, kind: input, shape index: {}]   ;;  %s4781_s4 = inlined_call_operand.<no memory space> [shape: f32[1,1], index: 4, kind: input, shape index: {}]   ;;  %s4782_s5 = inlined_call_operand.vmem [shape: f32[1,512], index: 5, kind: input, shape index: {}]   ;;  %s4783_s6 = inlined_call_operand.hbm [shape: bf16[512,128], index: 6, kind: input, shape index: {}]   ;;  %s4784_s7 = inlined_call_operand.vmem [shape: f32[1,128], index: 7, kind: input, shape index: {}]   ;;  %s4785_s8 = inlined_call_operand.hbm [shape: f32[16,128], index: 8, kind: output, shape index: {}]  }
   0x1   :  { %4800 = sst [smem:[#allocation21_spill]] %s4778_s1  ;;  %v13_v0 = vstv %s4781_s4 }
   0x2   :  { %14 = vst [vmem:[#allocation2] sm:$0x1] %v13_v0 }
   0x3   :  { %15 = vsyncpa [#allocation4], 0 }
   0x4   :  { %17 = vsyncpa [#allocation4 + $0x1], 0 }
   0x5   :  { %18 = vsyncpa [#allocation7], 0 }
   0x6   :  { %19 = vsyncpa [#allocation10], 0 }
   0x7   :  { %20 = vsyncpa [#allocation5], 0 }
   0x8   :  { %22 = vsyncpa [#allocation5 + $0x1], 0  ;;  %s3708_s29 = smov 0   ;;  %s3710_s30 = smov 0  }
   0x9   :  { %s3712_s9 = smov 0   ;;  %s3714_s10 = smov 0  }
   0xa LB: > { %s3729_s4 = sadd.s32 4294967295, %s3646_s10   ;;  %s3055_s11 = sadd.s32 4294967294, %s3646_s10   ;;  %s3646_s10 = sphi %s3714_s10, %s4873_s10   ;;  %s3642_s9 = sphi %s3712_s9, %s4872_s9   ;;  %s3638_s30 = sphi %s3710_s30, %s4871_s30   ;;  %s3634_s29 = sphi %s3708_s29, %s4870_s29  }
   0xb   : > { %p48_p0 = scmp.ne.s32.totalorder %s3638_s30, %s3634_s29  ;;  %p4786_p1 = scmp.eq.s32.totalorder %s3729_s4, 0 }
   0xc   : > { %p225_p3 = scmp.eq.s32.totalorder %s3055_s11, 1  ;;  %p3056_p5 = scmp.ge.s32.totalorder %s3646_s10, 1 }
   0xd   : > { %p3738_p4 = por %p4786_p1, %p48_p0  ;;  %p232_p7 = scmp.lt.s32.totalorder %s3646_s10, 3 }
   0xe   : > { %p3743_p6 = por %p225_p3, %p48_p0  ;;  %s3648_s15 = smov [#allocation6]  }
   0xf   : > { %s4801_s12 = scalar_select %p3738_p4, 1, 0 }
  0x10   : > { %s4802_s13 = scalar_select %p3743_p6, 1, 0 }
  0x11   : > { %p3748_p8 = pnand %p3056_p5, %p232_p7  ;;  %s244_s16 = sshll.u32 %s3648_s15, 4  ;;  %s245_s16 = int_to_ptr.vmem [resolvable:$true] %s244_s16 }
  0x12   : > { %s3649_s18 = smov [#allocation8]   ;;  %s3650_s20 = smov [#allocation9]  }
  0x13   : > { %s4803_s14 = scalar_select %p3748_p8, 1, 0 }
  0x14   : > { %p3300_p9 = pneg %p3748_p8  ;;  %s261_s19 = sshll.u32 %s3649_s18, 4  ;;  %s262_s19 = int_to_ptr.vmem [resolvable:$true] %s261_s19 }
  0x15   : > { %s277_s21 = sshll.u32 %s3650_s20, 4  ;;  %s3479_s22 = scalar_lea.vmem %s245_s16, 16384  ;;  %s278_s21 = int_to_ptr.vmem [resolvable:$true] %s277_s21 }
  0x16   : > { %p3757_p11 = pnand %p3300_p9, %p4786_p1  ;;  %p3480_p13 = scmp.ne.s32.totalorder %s245_s16, %s3479_s22 }
  0x17   : > { %p3487_p5 = scmp.lt.s32.totalorder %s245_s16, %s245_s16  ;;  %p3488_p7 = scmp.lt.s32.totalorder %s3479_s22, %s3479_s22 }
  0x18   : > { %p3470_p12 = pneg %p3757_p11 }
  0x19   : > { %p3489_p9 = por %p3488_p7, %p3487_p5 }
  0x1a   : > { %p3482_p0 = pnand %p3480_p13, %p3470_p12 }
  0x1c   : > { %p3483_p3 = pneg %p3482_p0 }
  0x1e   : > { %p3490_p10 = pnand %p3489_p9, %p3483_p3 }
  0x20   : > { %3493 = shalt.err (!%p3490_p10)
}
  0x21   : > { %s3651_s23 = smov 512   ;;  %s3652_s24 = smov 32  }
  0x22   : > { %s4805_s1 = sld [smem:[#allocation21_spill]]  ;;  %s3505_s27 = scalar_lea.vmem %s262_s19, 64 }
  0x23   : > { %p3506_p1 = scmp.ne.s32.totalorder %s262_s19, %s3505_s27  ;;  %p3513_p2 = scmp.lt.s32.totalorder %s262_s19, %s262_s19 }
  0x24   : > { %p3514_p6 = scmp.lt.s32.totalorder %s3505_s27, %s3505_s27 }
  0x25   : > { %p3508_p13 = pnand %p3506_p1, %p3470_p12 }
  0x26   : > { %p3515_p5 = por %p3514_p6, %p3513_p2 }
  0x27   : > { %p3509_p0 = pneg %p3508_p13 }
  0x28   : > { %3303 = dma.hbm_to_vmem [thread:$0]  (!%p3757_p11), %s4805_s1, 16384, %s245_s16, [#allocation7], %s3651_s23, %s3651_s23, %s3652_s24  }
  0x29   : > { %p3516_p3 = pnand %p3515_p5, %p3509_p0 }
  0x2b   : > { %3519 = shalt.err (!%p3516_p3)
}
  0x2c   : > { %3306 = dma.hbm_to_vmem [thread:$0]  (!%p3757_p11), %s4780_s3, 64, %s262_s19, [#allocation7]  }
  0x2d   : > { %s3531_s15 = scalar_lea.vmem %s278_s21, 4096  ;;  %p3539_p9 = scmp.lt.s32.totalorder %s278_s21, %s278_s21 }
  0x2e   : > { %p3532_p10 = scmp.ne.s32.totalorder %s278_s21, %s3531_s15  ;;  %p3540_p13 = scmp.lt.s32.totalorder %s3531_s15, %s3531_s15 }
  0x30   : > { %p3534_p7 = pnand %p3532_p10, %p3470_p12  ;;  %p3541_p4 = por %p3540_p13, %p3539_p9 }
  0x32   : > { %p3535_p1 = pneg %p3534_p7 }
  0x34   : > { %p3542_p2 = pnand %p3541_p4, %p3535_p1 }
  0x36   : > { %3545 = shalt.err (!%p3542_p2)
}
  0x37   : > { %s3653_s16 = smov 64   ;;  %s3654_s18 = smov 4  }
  0x38   : > { %3309 = dma.hbm_to_vmem [thread:$0]  (!%p3757_p11), %s4783_s6, 4096, %s278_s21, [#allocation10], %s3653_s16, %s3653_s16, %s3654_s18  }
  0x39   : > { %s3788_s22 = sadd.s32 1, %s3646_s10   ;;  %s35_s24 = sadd.s32 1, %s3642_s9 }
  0x3a   : > { %s32_s23 = ssub.s32 %s3646_s10, %s3788_s22  ;;  %p42_p6 = scmp.ne.s32.totalorder %s3642_s9, %s3638_s30 }
  0x3b   : > { %p33_p4 = scmp.eq.s32.totalorder %s32_s23, 0  ;;  %p43_p12 = scmp.eq.s32.totalorder %s3646_s10, 0 }
  0x3c   : > { %p3321_p0 = scmp.lt.s32.totalorder %s3646_s10, 2  ;;  %p4806_p3 = scmp.eq.s32.totalorder %s3729_s4, 1 }
  0x3d   : > { %s3798_s25 = scalar_select %p33_p4, %s3642_s9, %s35_s24  }
  0x3e   : > { %p44_p5 = por %p43_p12, %p42_p6  ;;  %p3802_p10 = por %p4806_p3, %p42_p6 }
  0x3f   : > { %s294_s17 = sand.u32 1, %s3642_s9   ;;  %s3239_s27 = sshll.u32 %s3646_s10, 13 }
  0x40   : > { %s4807_s26 = scalar_select %p3802_p10, 1, 0 }
  0x41   : > { %s3061_s21 = sshll.u32 %s294_s17, 9  ;;  %s3811_s15 = scalar_lea.hbm %s4777_s0, %s3239_s27 }
  0x42   : > { %s298_s16 = scalar_lea.vmem [#allocation3], %s3061_s21  ;;  %p3813_p11 = pnand %p3321_p0, %p44_p5 }
  0x43   : > { %s306_s18 = sshll.u32 %s298_s16, 4  ;;  %s3819_s20 = scalar_lea.sflag [#allocation4], %s294_s17  ;;  %s3817_s18 = int_to_ptr.vmem [resolvable:$true] %s306_s18 }
  0x44   : > { %s3546_s23 = scalar_lea.hbm %s3811_s15, 8192  ;;  %p3548_p1 = pneg %p3813_p11 }
  0x45   : > { %p3547_p7 = scmp.ne.s32.totalorder %s3811_s15, %s3546_s23  ;;  %s3551_s21 = scalar_lea.hbm %s4777_s0, 16384 }
  0x46   : > { %p3552_p2 = scmp.lt.s32.totalorder %s3811_s15, %s4777_s0  ;;  %p3553_p4 = scmp.lt.s32.totalorder %s3551_s21, %s3546_s23 }
  0x47   : > { %p3549_p9 = pnand %p3548_p1, %p3547_p7 }
  0x48   : > { %p3554_p6 = por %p3553_p4, %p3552_p2 }
  0x49   : > { %p3550_p13 = pneg %p3549_p9 }
  0x4b   : > { %p3555_p12 = pnand %p3554_p6, %p3550_p13 }
  0x4d   : > { %3558 = shalt.err (!%p3555_p12)
}
  0x4e   : > { %s3559_s17 = scalar_lea.vmem %s3817_s18, 8192  ;;  %s3655_s16 = smov [#allocation3]  }
  0x4f   : > { %p3560_p0 = scmp.ne.s32.totalorder %s3817_s18, %s3559_s17  ;;  %s3564_s1 = sshll.u32 %s3655_s16, 4  ;;  %s3565_s1 = int_to_ptr.vmem [resolvable:$false] %s3564_s1 }
  0x50   : > { %s3566_s24 = scalar_lea.vmem %s3565_s1, 16384  ;;  %p3567_p7 = scmp.lt.s32.totalorder %s3817_s18, %s3565_s1 }
  0x51   : > { %p3562_p5 = pnand %p3560_p0, %p3548_p1  ;;  %p3568_p9 = scmp.lt.s32.totalorder %s3566_s24, %s3559_s17 }
  0x53   : > { %p3563_p3 = pneg %p3562_p5  ;;  %p3569_p10 = por %p3568_p9, %p3567_p7 }
  0x55   : > { %p3570_p8 = pnand %p3569_p10, %p3563_p3 }
  0x57   : > { %3573 = shalt.err (!%p3570_p8)
}
  0x58   : > { %s3656_s23 = smov 128   ;;  %s3657_s27 = smov 8  }
  0x59   : > { %3313 = dma.hbm_to_vmem [thread:$0]  (!%p3813_p11), %s3811_s15, 8192, %s3817_s18, %s3819_s20, %s3656_s23, %s3656_s23, %s3657_s27  }
  0x5a   : > { %p4809_p1 = scmp.ne.s32.totalorder %s4803_s14, 0 }
  0x5c   : > { %318 = sbr.rel (%p4809_p1) target bundleno = 1153 (0x481), region = 52 }
  0x61   : > { %s3843_s21 = sand.u32 1, %s3638_s30   ;;  %p4810_p8 = scmp.ne.s32.totalorder %s4801_s12, 0 }
  0x62   : > { %s3066_s1 = sshll.u32 %s3843_s21, 9  ;;  %s321_s28 = scalar_lea.sflag [#allocation4], %s3843_s21 }
  0x63   : > { %s3847_s11 = scalar_lea.vmem [#allocation3], %s3066_s1 }
  0x64   : > { %3617 = dma.done.wait (%p4810_p8), %s321_s28, 8192  }
  0x65   : > { %3619 = vsyncadd (%p4810_p8), %s321_s28, 4294959104  ;;  %p4811_p10 = scmp.eq.s32.totalorder %s3729_s4, 0 }
  0x67   : > { %3621 = dma.done.wait (%p4811_p10), [#allocation7], 16448   ;;  %p4812_p11 = pmov %p4811_p10 }
  0x68   : > { %p4813_p13 = pmov %p4811_p10 }
  0x69   : > { %3623 = vsyncadd (%p4812_p11), [#allocation7], 4294950848 }
  0x6a   : > { %3625 = dma.done.wait (%p4813_p13), [#allocation10], 4096   ;;  %p4814_p2 = pmov %p4811_p10 }
  0x6b   : > { %v1547_v1 = vld [vmem:[#allocation6 + $0x1c0] sm:$0xff]  ;;  %v1548_v3 = vld [vmem:[#allocation6 + $0x1c8] sm:$0xff]  ;;  %vm1651_vm0 = vcmask 1041409   ;;  %vm1653_vm1 = vcmask 1042434   ;;  %vm1655_vm2 = vcmask 1043459   ;;  %vm1657_vm3 = vcmask 1044484  }
  0x6c   : > { %3627 = vsyncadd (%p4814_p2), [#allocation10], 4294963200  ;;  %v1551_v2 = vld [vmem:[#allocation6 + $0x1e0] sm:$0xff]  ;;  %v1552_v5 = vld [vmem:[#allocation6 + $0x1e8] sm:$0xff]  ;;  %vm1659_vm4 = vcmask 1045509   ;;  %vm1661_vm5 = vcmask 1046534  }
  0x6d   : > { %v3128_v4 = vcombine.high %v1547_v1, %v1551_v2  ;;  %v3127_v6 = vcombine.low %v1547_v1, %v1551_v2  ;;  %v1539_v7 = vld [vmem:[#allocation6 + $0x180] sm:$0xff]  ;;  %v3130_v9 = vcombine.high %v1548_v3, %v1552_v5  ;;  %v3129_v10 = vcombine.low %v1548_v3, %v1552_v5  ;;  %v1540_v12 = vld [vmem:[#allocation6 + $0x188] sm:$0xff]  ;;  %s3070_s19 = sshll.u32 %s3843_s21, 3  ;;  %s3235_s16 = sshll.u32 %s3729_s4, 7 }
  0x6e   : > { %v1543_v8 = vld [vmem:[#allocation6 + $0x1a0] sm:$0xff]  ;;  %v1544_v13 = vld [vmem:[#allocation6 + $0x1a8] sm:$0xff]  ;;  %vm1663_vm6 = vcmask 1047559   ;;  %s368_s24 = scalar_lea.vmem [#allocation11], %s3070_s19  ;;  %s2954_s28 = scalar_lea.hbm %s4785_s8, %s3235_s16 }
  0x6f   : > { %v3120_v11 = vcombine.high %v1539_v7, %v1543_v8  ;;  %v1531_v14 = vld [vmem:[#allocation6 + $0x140] sm:$0xff]  ;;  %2316 = vmatprep.subr.bf16.mxu0 %v3128_v4  ;;  %v3122_v15 = vcombine.high %v1540_v12, %v1544_v13  ;;  %v1532_v17 = vld [vmem:[#allocation6 + $0x148] sm:$0xff]  ;;  %2357 = vmatprep.subr.bf16.mxu1 %v3130_v9  ;;  %v3119_v19 = vcombine.low %v1539_v7, %v1543_v8  ;;  %s2956_s23 = sshll.u32 %s368_s24, 4  ;;  %p4867_p6 = scmp.ne.s32.totalorder %s4807_s26, 0  ;;  %s2957_s23 = int_to_ptr.vmem [resolvable:$true] %s2956_s23 }
  0x70   : > { %v1535_v16 = vld [vmem:[#allocation6 + $0x160] sm:$0xff]  ;;  %v1536_v18 = vld [vmem:[#allocation6 + $0x168] sm:$0xff]  ;;  %2317 = vmatpush1.bf16.msra.mxu0 %v3127_v6  ;;  %2358 = vmatpush1.bf16.msra.mxu1 %v3129_v10  ;;  %v3121_v23 = vcombine.low %v1540_v12, %v1544_v13  ;;  %s3574_s12 = scalar_lea.vmem %s2957_s23, 128  ;;  %s3659_s4 = smov [#allocation11]  }
  0x71   : > { %v3861_v20 = vld [vmem:[#allocation6 + $0x100] sm:$0xff]  ;;  %v3865_v22 = vld [vmem:[#allocation6 + $0x108] sm:$0xff]  ;;  %2318 = vmatprep.subr.bf16.mxu0 %v3120_v11  ;;  %v3112_v24 = vcombine.high %v1531_v14, %v1535_v16  ;;  %2359 = vmatprep.subr.bf16.mxu1 %v3122_v15  ;;  %v3114_v28 = vcombine.high %v1532_v17, %v1536_v18  ;;  %v3111_v35 = vcombine.low %v1531_v14, %v1535_v16  ;;  %p3575_p4 = scmp.ne.s32.totalorder %s2957_s23, %s3574_s12  ;;  %s3578_s14 = sshll.u32 %s3659_s4, 4  ;;  %s3579_s14 = int_to_ptr.vmem [resolvable:$false] %s3578_s14 }
  0x72   : > { %v3863_v21 = vld [vmem:[#allocation6 + $0x120] sm:$0xff]  ;;  %v3867_v25 = vld [vmem:[#allocation6 + $0x128] sm:$0xff]  ;;  %v3113_v36 = vcombine.low %v1532_v17, %v1536_v18  ;;  %s3580_s15 = scalar_lea.vmem %s3579_s14, 256  ;;  %p3581_p5 = scmp.lt.s32.totalorder %s2957_s23, %s3579_s14 }
  0x73   : > { %v3869_v26 = vld [vmem:[#allocation6 + $0xc0] sm:$0xff]  ;;  %v3873_v29 = vld [vmem:[#allocation6 + $0xc8] sm:$0xff]  ;;  %v3104_v37 = vcombine.high %v3861_v20, %v3863_v21  ;;  %v3103_v38 = vcombine.low %v3861_v20, %v3863_v21  ;;  %v3106_v42 = vcombine.high %v3865_v22, %v3867_v25  ;;  %v3105_v43 = vcombine.low %v3865_v22, %v3867_v25  ;;  %p3576_p12 = pnand %p3575_p4, %p4867_p6  ;;  %p3582_p3 = scmp.lt.s32.totalorder %s3580_s15, %s3574_s12 }
  0x74   : > { %v3871_v27 = vld [vmem:[#allocation6 + $0xe0] sm:$0xff]  ;;  %v3875_v30 = vld [vmem:[#allocation6 + $0xe8] sm:$0xff]  ;;  %2319 = vmatpush1.bf16.msra.mxu0 %v3119_v19  ;;  %2360 = vmatpush1.bf16.msra.mxu1 %v3121_v23 }
  0x75   : > { %v3877_v31 = vld [vmem:[#allocation6 + $0x80] sm:$0xff]  ;;  %v3881_v33 = vld [vmem:[#allocation6 + $0x88] sm:$0xff]  ;;  %2320 = vmatprep.subr.bf16.mxu0 %v3112_v24  ;;  %v3096_v44 = vcombine.high %v3869_v26, %v3871_v27  ;;  %2361 = vmatprep.subr.bf16.mxu1 %v3114_v28  ;;  %v3098_v48 = vcombine.high %v3873_v29, %v3875_v30  ;;  %v3095_v49 = vcombine.low %v3869_v26, %v3871_v27  ;;  %p3577_p0 = pneg %p3576_p12  ;;  %p3583_p7 = por %p3582_p3, %p3581_p5 }
  0x76   : > { %v3879_v32 = vld [vmem:[#allocation6 + $0xa0] sm:$0xff]  ;;  %v3883_v34 = vld [vmem:[#allocation6 + $0xa8] sm:$0xff]  ;;  %v3097_v50 = vcombine.low %v3873_v29, %v3875_v30 }
  0x77   : > { %v3889_v39 = vld [vmem:[#allocation6 + $0x40] sm:$0xff]  ;;  %v3893_v41 = vld [vmem:[#allocation6 + $0x48] sm:$0xff]  ;;  %v3088_v51 = vcombine.high %v3877_v31, %v3879_v32  ;;  %v3090_v55 = vcombine.high %v3881_v33, %v3883_v34  ;;  %v3087_v56 = vcombine.low %v3877_v31, %v3879_v32  ;;  %v3089_v57 = vcombine.low %v3881_v33, %v3883_v34  ;;  %p3584_p9 = pnand %p3583_p7, %p3577_p0 }
  0x78   : > { %v3891_v40 = vld [vmem:[#allocation6 + $0x60] sm:$0xff]  ;;  %v3901_v45 = vld [vmem:[#allocation6 + $0x68] sm:$0xff]  ;;  %2321 = vmatpush1.bf16.msra.mxu0 %v3111_v35  ;;  %2362 = vmatpush1.bf16.msra.mxu1 %v3113_v36 }
  0x79   : > { %v3903_v46 = vld [vmem:[#allocation6] sm:$0xff]  ;;  %v3915_v52 = vld [vmem:[#allocation6 + $0x8] sm:$0xff]  ;;  %2322 = vmatprep.subr.bf16.mxu0 %v3104_v37  ;;  %2363 = vmatprep.subr.bf16.mxu1 %v3106_v42  ;;  %v4821_v31 = vcombine.high %v3893_v41, %v3901_v45 }
  0x7a   : > { %v3905_v47 = vld [vmem:[#allocation6 + $0x20] sm:$0xff]  ;;  %v3917_v53 = vld [vmem:[#allocation6 + $0x28] sm:$0xff] }
  0x7b   : > { %v3919_v54 = vld [vmem:[#allocation6 + $0x3c0] sm:$0xff]  ;;  %v3931_v60 = vld [vmem:[#allocation6 + $0x3c8] sm:$0xff] }
  0x7c   : > { %v3929_v59 = vld [vmem:[#allocation6 + $0x3e0] sm:$0xff]  ;;  %v3933_v61 = vld [vmem:[#allocation6 + $0x3e8] sm:$0xff]  ;;  %2323 = vmatpush1.bf16.msra.mxu0 %v3103_v38  ;;  %2364 = vmatpush1.bf16.msra.mxu1 %v3105_v43 }
  0x7d   : > { %v3943_v2 = vld [vmem:[#allocation6 + $0x380] sm:$0xff]  ;;  %v3947_v4 = vld [vmem:[#allocation6 + $0x388] sm:$0xff]  ;;  %2324 = vmatprep.subr.bf16.mxu0 %v3096_v44  ;;  %2365 = vmatprep.subr.bf16.mxu1 %v3098_v48 }
  0x7e   : > { %v3945_v3 = vld [vmem:[#allocation6 + $0x3a0] sm:$0xff]  ;;  %v3955_v8 = vld [vmem:[#allocation6 + $0x3a8] sm:$0xff] }
  0x7f   : > { %v3957_v9 = vld [vmem:[#allocation6 + $0x340] sm:$0xff]  ;;  %v3969_v15 = vld [vmem:[#allocation6 + $0x348] sm:$0xff] }
  0x80   : > { %v3959_v10 = vld [vmem:[#allocation6 + $0x360] sm:$0xff]  ;;  %v3971_v16 = vld [vmem:[#allocation6 + $0x368] sm:$0xff]  ;;  %2325 = vmatpush1.bf16.msra.mxu0 %v3095_v49  ;;  %2366 = vmatpush1.bf16.msra.mxu1 %v3097_v50 }
  0x81   : > { %v3973_v17 = vld [vmem:[#allocation6 + $0x300] sm:$0xff]  ;;  %v3985_v23 = vld [vmem:[#allocation6 + $0x308] sm:$0xff]  ;;  %2326 = vmatprep.subr.bf16.mxu0 %v3088_v51  ;;  %2367 = vmatprep.subr.bf16.mxu1 %v3090_v55 }
  0x82   : > { %v3983_v22 = vld [vmem:[#allocation6 + $0x320] sm:$0xff]  ;;  %v3987_v24 = vld [vmem:[#allocation6 + $0x328] sm:$0xff] }
  0x83   : > { %v3997_v37 = vld [vmem:[#allocation6 + $0x2c0] sm:$0xff]  ;;  %v4001_v21 = vld [vmem:[#allocation6 + $0x2c8] sm:$0xff] }
  0x84   : > { %v3999_v42 = vld [vmem:[#allocation6 + $0x2e0] sm:$0xff]  ;;  %v4009_v25 = vld [vmem:[#allocation6 + $0x2e8] sm:$0xff]  ;;  %2327 = vmatpush1.bf16.msra.mxu0 %v3087_v56  ;;  %2368 = vmatpush1.bf16.msra.mxu1 %v3089_v57  ;;  %v4822_v57 = vcombine.low %v3889_v39, %v3891_v40 }
  0x85   : > { %v4011_v36 = vld [vmem:[#allocation6 + $0x280] sm:$0xff]  ;;  %v4023_v35 = vld [vmem:[#allocation6 + $0x288] sm:$0xff]  ;;  %2369 = vmatprep.subr.bf16.mxu1 %v4821_v31 }
  0x86   : > { %v4013_v20 = vld [vmem:[#allocation6 + $0x2a0] sm:$0xff]  ;;  %v4025_v19 = vld [vmem:[#allocation6 + $0x2a8] sm:$0xff] }
  0x87   : > { %v4027_v18 = vld [vmem:[#allocation6 + $0x240] sm:$0xff]  ;;  %v4039_v28 = vld [vmem:[#allocation6 + $0x248] sm:$0xff] }
  0x88   : > { %v4037_v14 = vld [vmem:[#allocation6 + $0x260] sm:$0xff]  ;;  %v4041_v13 = vld [vmem:[#allocation6 + $0x268] sm:$0xff] }
  0x89   : > { %v4054_v12 = vld [vmem:[#allocation6 + $0x200] sm:$0xff]  ;;  %v4058_v27 = vld [vmem:[#allocation6 + $0x208] sm:$0xff] }
  0x8a   : > { %4815 = vst [vmem:[#allocation16_spill] sm:$0xff] %v4054_v12  ;;  %v4056_v26 = vld [vmem:[#allocation6 + $0x220] sm:$0xff]  ;;  %4817 = vst [vmem:[#allocation18_spill] sm:$0xff] %v4058_v27  ;;  %v4070_v38 = vld [vmem:[#allocation6 + $0x228] sm:$0xff]  ;;  %v4823_v12 = vcombine.low %v3893_v41, %v3901_v45 }
  0x8b   : > { %4816 = vst [vmem:[#allocation17_spill] sm:$0xff] %v4056_v26  ;;  %4818 = vst [vmem:[#allocation19_spill] sm:$0xff] %v4070_v38  ;;  %v4075_v29 = vld [vmem:[%s3847_s11] sm:$0xff] }
  0x8c   : > { %4819 = vst [vmem:[#allocation20_spill] sm:$0xff] %v4075_v29  ;;  %v372_v30 = vld [vmem:[%s3847_s11 + $0x40] sm:$0xff]  ;;  %v380_v11 = vunpack.c.h.bf16 %v4075_v29  ;;  %2370 = vmatpush1.bf16.msra.mxu1 %v4823_v12 }
  0x8d   : > { %v373_v49 = vld [vmem:[%s3847_s11 + $0x80] sm:$0xff]  ;;  %v382_v7 = vunpack.c.h.bf16 %v372_v30  ;;  %v4820_v30 = vcombine.high %v3889_v39, %v3891_v40  ;;  %v4825_v39 = vcombine.high %v3915_v52, %v3917_v53 }
  0x8e   : > { %v374_v48 = vld [vmem:[%s3847_s11 + $0xc0] sm:$0xff]  ;;  %v384_v1 = vunpack.c.h.bf16 %v373_v49  ;;  %v401_v58 = vrot.slane %v380_v11, 4 }
  0x8f   : > { %v375_v43 = vld [vmem:[%s3847_s11 + $0x100] sm:$0xff]  ;;  %v386_v0 = vunpack.c.h.bf16 %v374_v48  ;;  %2328 = vmatprep.subr.bf16.mxu0 %v4820_v30  ;;  %v413_v48 = vrot.slane %v382_v7, 4  ;;  %2371 = vmatprep.subr.bf16.mxu1 %v4825_v39  ;;  %v514_v39 = vld [vmem:[%s3847_s11 + $0x1c8] sm:$0xff] }
  0x90   : > { %v376_v44 = vld [vmem:[%s3847_s11 + $0x140] sm:$0xff]  ;;  %v388_v63 = vunpack.c.h.bf16 %v375_v43  ;;  %v425_v43 = vrot.slane %v384_v1, 4  ;;  %v402_v32 = vadd.f32 %v401_v58, %v380_v11  ;;  %2329 = vmatpush1.bf16.msra.mxu0 %v4822_v57  ;;  %v4824_v58 = vcombine.high %v3903_v46, %v3905_v47  ;;  %v511_v57 = vld [vmem:[%s3847_s11 + $0x108] sm:$0xff] }
  0x91   : > { %v377_v6 = vld [vmem:[%s3847_s11 + $0x180] sm:$0xff]  ;;  %v390_v50 = vunpack.c.h.bf16 %v376_v44  ;;  %v437_v49 = vrot.slane %v386_v0, 4  ;;  %v414_v44 = vadd.f32 %v413_v48, %v382_v7 }
  0x92   : > { %v378_v5 = vld [vmem:[%s3847_s11 + $0x1c0] sm:$0xff]  ;;  %v392_v51 = vunpack.c.h.bf16 %v377_v6  ;;  %v449_v55 = vrot.slane %v388_v63, 4  ;;  %v426_v29 = vadd.f32 %v425_v43, %v384_v1  ;;  %v403_v30 = vrot.slane %v402_v32, 2  ;;  %2330 = vmatprep.subr.bf16.mxu0 %v4824_v58 }
  0x93   : > { %v394_v62 = vunpack.c.h.bf16 %v378_v5  ;;  %v461_v56 = vrot.slane %v390_v50, 4  ;;  %v438_v33 = vadd.f32 %v437_v49, %v386_v0  ;;  %v415_v7 = vrot.slane %v414_v44, 2 }
  0x94   : > { %v473_v5 = vrot.slane %v392_v51, 4  ;;  %v450_v34 = vadd.f32 %v449_v55, %v388_v63  ;;  %v427_v1 = vrot.slane %v426_v29, 2  ;;  %v404_v40 = vadd.f32 %v403_v30, %v402_v32 }
  0x95   : > { %v485_v6 = vrot.slane %v394_v62, 4  ;;  %v462_v38 = vadd.f32 %v461_v56, %v390_v50  ;;  %v439_v0 = vrot.slane %v438_v33, 2  ;;  %v4826_v55 = vcombine.low %v3903_v46, %v3905_v47  ;;  %v507_v47 = vld [vmem:[%s3847_s11 + $0x8] sm:$0xff] }
  0x96   : > { %v474_v27 = vadd.f32 %v473_v5, %v392_v51  ;;  %v451_v63 = vrot.slane %v450_v34, 2  ;;  %v416_v51 = vadd.f32 %v415_v7, %v414_v44  ;;  %v428_v41 = vadd.f32 %v427_v1, %v426_v29 }
  0x97   : > { %v486_v26 = vadd.f32 %v485_v6, %v394_v62  ;;  %v463_v11 = vrot.slane %v462_v38, 2  ;;  %v440_v45 = vadd.f32 %v439_v0, %v438_v33  ;;  %2331 = vmatpush1.bf16.msra.mxu0 %v4826_v55  ;;  %v405_v48 = vrot.slane %v404_v40, 1  ;;  %v509_v33 = vld [vmem:[%s3847_s11 + $0x88] sm:$0xff] }
  0x98   : > { %v475_v50 = vrot.slane %v474_v27, 2  ;;  %v452_v12 = vadd.f32 %v451_v63, %v450_v34  ;;  %v4827_v32 = vcombine.low %v3915_v52, %v3917_v53  ;;  %v4828_v29 = vcombine.high %v3919_v54, %v3929_v59  ;;  %v510_v34 = vld [vmem:[%s3847_s11 + $0xc8] sm:$0xff] }
  0x99   : > { %v487_v62 = vrot.slane %v486_v26, 2  ;;  %v464_v43 = vadd.f32 %v463_v11, %v462_v38  ;;  %v417_v56 = vrot.slane %v416_v51, 1  ;;  %v429_v5 = vrot.slane %v428_v41, 1  ;;  %v508_v38 = vld [vmem:[%s3847_s11 + $0x48] sm:$0xff] }
  0x9a   : > { %v476_v49 = vadd.f32 %v475_v50, %v474_v27  ;;  %2372 = vmatpush1.bf16.msra.mxu1 %v4827_v32  ;;  %2332 = vmatprep.subr.bf16.mxu0 %v4828_v29  ;;  %v441_v6 = vrot.slane %v440_v45, 1  ;;  %v453_v46 = vrot.slane %v452_v12, 1  ;;  %v4131_v52 = vadd.f32 %v405_v48, %v404_v40  ;;  %v512_v0 = vld [vmem:[%s3847_s11 + $0x148] sm:$0xff]  ;;  %v4166_v29 = vld [vmem:[%s3847_s11 + $0x10] sm:$0xff] }
  0x9b   : > { %v488_v31 = vadd.f32 %v487_v62, %v486_v26  ;;  %v4829_v26 = vcombine.high %v3931_v60, %v3933_v61  ;;  %v465_v53 = vrot.slane %v464_v43, 1  ;;  %v4136_v30 = vadd.f32 %v417_v56, %v416_v51  ;;  %v513_v63 = vld [vmem:[%s3847_s11 + $0x188] sm:$0xff] }
  0x9c   : > { %v477_v27 = vrot.slane %v476_v49, 1  ;;  %v4138_v58 = vadd.f32 %v429_v5, %v428_v41  ;;  %v4140_v7 = vadd.f32 %v441_v6, %v440_v45  ;;  %v4142_v1 = vadd.f32 %v453_v46, %v452_v12 }
  0x9d   : > { %2373 = vmatprep.subr.bf16.mxu1 %v4829_v26  ;;  %v489_v44 = vrot.slane %v488_v31, 1  ;;  %v4830_v40 = vcombine.low %v3919_v54, %v3929_v59  ;;  %v4150_v11 = vadd.f32 %v465_v53, %v464_v43  ;;  %v516_v51 = vunpack.c.h.bf16 %v507_v47 }
  0x9e   : > { %v4152_v50 = vadd.f32 %v477_v27, %v476_v49  ;;  %v4831_v41 = vcombine.low %v3931_v60, %v3933_v61  ;;  %v4832_v45 = vcombine.high %v3943_v2, %v3945_v3  ;;  %v518_v12 = vunpack.c.h.bf16 %v508_v38 }
  0x9f   : > { %2333 = vmatpush2.bf16.msra.mxu0 %v4830_v40  ;;  %v4154_v62 = vadd.f32 %v489_v44, %v488_v31  ;;  %v520_v55 = vunpack.c.h.bf16 %v509_v33  ;;  %v522_v54 = vunpack.c.h.bf16 %v510_v34  ;;  %v524_v59 = vunpack.c.h.bf16 %v511_v57 }
  0xa0   : > { %2374 = vmatpush2.bf16.msra.mxu1 %v4831_v41  ;;  %2334 = vmatprep.subr.bf16.mxu0 %v4832_v45  ;;  %v4833_v48 = vcombine.high %v3947_v4, %v3955_v8  ;;  %v526_v43 = vunpack.c.h.bf16 %v512_v0  ;;  %v528_v49 = vunpack.c.h.bf16 %v513_v63  ;;  %v530_v31 = vunpack.c.h.bf16 %v514_v39 }
  0xa1   : > { %v537_v32 = vrot.slane %v516_v51, 4  ;;  %v549_v60 = vrot.slane %v518_v12, 4  ;;  %v561_v61 = vrot.slane %v520_v55, 4  ;;  %v573_v56 = vrot.slane %v522_v54, 4 }
  0xa2   : > { %2375 = vmatprep.subr.bf16.mxu1 %v4833_v48  ;;  %v585_v5 = vrot.slane %v524_v59, 4  ;;  %v4834_v6 = vcombine.low %v3943_v2, %v3945_v3  ;;  %v597_v47 = vrot.slane %v526_v43, 4  ;;  %v609_v38 = vrot.slane %v528_v49, 4 }
  0xa3   : > { %v538_v46 = vadd.f32 %v537_v32, %v516_v51  ;;  %v621_v26 = vrot.slane %v530_v31, 4  ;;  %v4835_v53 = vcombine.low %v3947_v4, %v3955_v8  ;;  %v4836_v27 = vcombine.high %v3957_v9, %v3959_v10 }
  0xa4   : > { %2335 = vmatpush2.bf16.msra.mxu0 %v4834_v6  ;;  %v550_v44 = vadd.f32 %v549_v60, %v518_v12  ;;  %v562_v33 = vadd.f32 %v561_v61, %v520_v55  ;;  %v574_v34 = vadd.f32 %v573_v56, %v522_v54  ;;  %v652_v57 = vunpack.c.h.bf16 %v4166_v29 }
  0xa5   : > { %2376 = vmatpush2.bf16.msra.mxu1 %v4835_v53  ;;  %2336 = vmatprep.subr.bf16.mxu0 %v4836_v27  ;;  %v4837_v2 = vcombine.high %v3969_v15, %v3971_v16  ;;  %v539_v3 = vrot.slane %v538_v46, 2  ;;  %v586_v0 = vadd.f32 %v585_v5, %v524_v59  ;;  %v598_v63 = vadd.f32 %v597_v47, %v526_v43 }
  0xa6   : > { %v610_v39 = vadd.f32 %v609_v38, %v528_v49  ;;  %v551_v40 = vrot.slane %v550_v44, 2  ;;  %v563_v4 = vrot.slane %v562_v33, 2  ;;  %v575_v8 = vrot.slane %v574_v34, 2 }
  0xa7   : > { %2377 = vmatprep.subr.bf16.mxu1 %v4837_v2  ;;  %v622_v51 = vadd.f32 %v621_v26, %v530_v31  ;;  %v4838_v41 = vcombine.low %v3957_v9, %v3959_v10  ;;  %v540_v45 = vadd.f32 %v539_v3, %v538_v46  ;;  %v587_v12 = vrot.slane %v586_v0, 2  ;;  %v644_v46 = vld [vmem:[%s3847_s11 + $0x50] sm:$0xff] }
  0xa8   : > { %v599_v55 = vrot.slane %v598_v63, 2  ;;  %v611_v54 = vrot.slane %v610_v39, 2  ;;  %v4839_v48 = vcombine.low %v3969_v15, %v3971_v16  ;;  %v4840_v59 = vcombine.high %v3973_v17, %v3983_v22 }
  0xa9   : > { %2337 = vmatpush2.bf16.msra.mxu0 %v4838_v41  ;;  %v552_v43 = vadd.f32 %v551_v40, %v550_v44  ;;  %v564_v49 = vadd.f32 %v563_v4, %v562_v33  ;;  %v576_v31 = vadd.f32 %v575_v8, %v574_v34  ;;  %v623_v32 = vrot.slane %v622_v51, 2  ;;  %v645_v44 = vld [vmem:[%s3847_s11 + $0x90] sm:$0xff] }
  0xaa   : > { %2378 = vmatpush2.bf16.msra.mxu1 %v4839_v48  ;;  %2338 = vmatprep.subr.bf16.mxu0 %v4840_v59  ;;  %v4841_v9 = vcombine.high %v3985_v23, %v3987_v24  ;;  %v541_v10 = vrot.slane %v540_v45, 1  ;;  %v588_v60 = vadd.f32 %v587_v12, %v586_v0  ;;  %v600_v15 = vadd.f32 %v599_v55, %v598_v63  ;;  %v646_v33 = vld [vmem:[%s3847_s11 + $0xd0] sm:$0xff] }
  0xab   : > { %v612_v16 = vadd.f32 %v611_v54, %v610_v39  ;;  %v553_v61 = vrot.slane %v552_v43, 1  ;;  %v565_v56 = vrot.slane %v564_v49, 1  ;;  %v577_v5 = vrot.slane %v576_v31, 1  ;;  %v647_v34 = vld [vmem:[%s3847_s11 + $0x110] sm:$0xff] }
  0xac   : > { %2379 = vmatprep.subr.bf16.mxu1 %v4841_v9  ;;  %v624_v6 = vadd.f32 %v623_v32, %v622_v51  ;;  %v4842_v47 = vcombine.low %v3973_v17, %v3983_v22  ;;  %v542_v38 = vadd.f32 %v541_v10, %v540_v45  ;;  %v589_v26 = vrot.slane %v588_v60, 1  ;;  %v648_v39 = vld [vmem:[%s3847_s11 + $0x150] sm:$0xff] }
  0xad   : > { %v601_v53 = vrot.slane %v600_v15, 1  ;;  %v613_v27 = vrot.slane %v612_v16, 1  ;;  %v4843_v2 = vcombine.low %v3985_v23, %v3987_v24  ;;  %v4844_v3 = vcombine.high %v3997_v37, %v3999_v42  ;;  %v649_v40 = vld [vmem:[%s3847_s11 + $0x190] sm:$0xff] }
  0xae   : > { %2339 = vmatpush2.bf16.msra.mxu0 %v4842_v47  ;;  %v554_v0 = vadd.f32 %v553_v61, %v552_v43  ;;  %v566_v17 = vadd.f32 %v565_v56, %v564_v49  ;;  %v578_v22 = vadd.f32 %v577_v5, %v576_v31  ;;  %v625_v63 = vrot.slane %v624_v6, 1  ;;  %v650_v4 = vld [vmem:[%s3847_s11 + $0x1d0] sm:$0xff] }
  0xaf   : > { %2380 = vmatpush2.bf16.msra.mxu1 %v4843_v2  ;;  %2340 = vmatprep.subr.bf16.mxu0 %v4844_v3  ;;  %v4845_v8 = vcombine.high %v4001_v21, %v4009_v25  ;;  %v590_v51 = vadd.f32 %v589_v26, %v588_v60  ;;  %v602_v41 = vadd.f32 %v601_v53, %v600_v15  ;;  %v654_v43 = vunpack.c.h.bf16 %v644_v46 }
  0xb0   : > { %v614_v45 = vadd.f32 %v613_v27, %v612_v16  ;;  %v4213_v23 = vadd.f32 %v542_v38, %v4131_v52  ;;  %v626_v24 = vadd.f32 %v625_v63, %v624_v6  ;;  %v4216_v12 = vadd.f32 %v554_v0, %v4136_v30  ;;  %v4856_v63 = vld [vmem:[#allocation16_spill] sm:$0xff] }
  0xb1   : > { %2381 = vmatprep.subr.bf16.mxu1 %v4845_v8  ;;  %v4219_v55 = vadd.f32 %v566_v17, %v4138_v58  ;;  %v4222_v54 = vadd.f32 %v578_v22, %v4140_v7  ;;  %v4846_v48 = vcombine.low %v3997_v37, %v3999_v42  ;;  %v4228_v59 = vadd.f32 %v590_v51, %v4142_v1 }
  0xb2   : > { %v4231_v52 = vadd.f32 %v602_v41, %v4150_v11  ;;  %v4234_v30 = vadd.f32 %v614_v45, %v4152_v50  ;;  %v4847_v58 = vcombine.low %v4001_v21, %v4009_v25  ;;  %v4848_v7 = vcombine.high %v4011_v36, %v4013_v20  ;;  %v4251_v25 = vld [vmem:[%s3847_s11 + $0x18] sm:$0xff]  ;;  %v4859_v45 = vld [vmem:[#allocation18_spill] sm:$0xff] }
  0xb3   : > { %2341 = vmatpush2.bf16.msra.mxu0 %v4846_v48  ;;  %v4243_v37 = vadd.f32 %v626_v24, %v4154_v62  ;;  %v656_v42 = vunpack.c.h.bf16 %v645_v44  ;;  %v658_v1 = vunpack.c.h.bf16 %v646_v33  ;;  %v660_v49 = vunpack.c.h.bf16 %v647_v34 }
  0xb4   : > { %2382 = vmatpush2.bf16.msra.mxu1 %v4847_v58  ;;  %2342 = vmatprep.subr.bf16.mxu0 %v4848_v7  ;;  %v4849_v11 = vcombine.high %v4023_v35, %v4025_v19  ;;  %v662_v50 = vunpack.c.h.bf16 %v648_v39  ;;  %v664_v31 = vunpack.c.h.bf16 %v649_v40  ;;  %v666_v32 = vunpack.c.h.bf16 %v650_v4  ;;  %v4857_v39 = vld [vmem:[#allocation17_spill] sm:$0xff] }
  0xb5   : > { %v673_v21 = vrot.slane %v652_v57, 4  ;;  %v685_v9 = vrot.slane %v654_v43, 4  ;;  %v697_v10 = vrot.slane %v656_v42, 4  ;;  %v709_v60 = vrot.slane %v658_v1, 4 }
  0xb6   : > { %2383 = vmatprep.subr.bf16.mxu1 %v4849_v11  ;;  %v721_v62 = vrot.slane %v660_v49, 4  ;;  %v4850_v15 = vcombine.low %v4011_v36, %v4013_v20  ;;  %v733_v61 = vrot.slane %v662_v50, 4  ;;  %v745_v56 = vrot.slane %v664_v31, 4 }
  0xb7   : > { %v674_v16 = vadd.f32 %v673_v21, %v652_v57  ;;  %v757_v5 = vrot.slane %v666_v32, 4  ;;  %v4851_v6 = vcombine.low %v4023_v35, %v4025_v19  ;;  %v4852_v46 = vcombine.high %v4027_v18, %v4037_v14  ;;  %v781_v21 = vld [vmem:[%s3847_s11 + $0x98] sm:$0xff] }
  0xb8   : > { %2343 = vmatpush2.bf16.msra.mxu0 %v4850_v15  ;;  %v686_v47 = vadd.f32 %v685_v9, %v654_v43  ;;  %v698_v38 = vadd.f32 %v697_v10, %v656_v42  ;;  %v710_v26 = vadd.f32 %v709_v60, %v658_v1  ;;  %v788_v20 = vunpack.c.h.bf16 %v4251_v25  ;;  %v780_v1 = vld [vmem:[%s3847_s11 + $0x58] sm:$0xff] }
  0xb9   : > { %2384 = vmatpush2.bf16.msra.mxu1 %v4851_v6  ;;  %2344 = vmatprep.subr.bf16.mxu0 %v4852_v46  ;;  %v4853_v36 = vcombine.high %v4039_v28, %v4041_v13  ;;  %v675_v29 = vrot.slane %v674_v16, 2  ;;  %v722_v57 = vadd.f32 %v721_v62, %v660_v49  ;;  %v734_v53 = vadd.f32 %v733_v61, %v662_v50  ;;  %v782_v9 = vld [vmem:[%s3847_s11 + $0xd8] sm:$0xff] }
  0xba   : > { %v746_v27 = vadd.f32 %v745_v56, %v664_v31  ;;  %v687_v44 = vrot.slane %v686_v47, 2  ;;  %v699_v19 = vrot.slane %v698_v38, 2  ;;  %v711_v35 = vrot.slane %v710_v26, 2  ;;  %v783_v10 = vld [vmem:[%s3847_s11 + $0x118] sm:$0xff] }
  0xbb   : > { %2385 = vmatprep.subr.bf16.mxu1 %v4853_v36  ;;  %v758_v33 = vadd.f32 %v757_v5, %v666_v32  ;;  %v4854_v34 = vcombine.low %v4027_v18, %v4037_v14  ;;  %v676_v2 = vadd.f32 %v675_v29, %v674_v16  ;;  %v723_v3 = vrot.slane %v722_v57, 2  ;;  %v4860_v14 = vld [vmem:[#allocation19_spill] sm:$0xff]  ;;  %v784_v56 = vld [vmem:[%s3847_s11 + $0x158] sm:$0xff] }
  0xbc   : > { %v735_v0 = vrot.slane %v734_v53, 2  ;;  %v747_v17 = vrot.slane %v746_v27, 2  ;;  %v4855_v22 = vcombine.low %v4039_v28, %v4041_v13  ;;  %v4858_v40 = vcombine.high %v4856_v63, %v4857_v39  ;;  %v785_v5 = vld [vmem:[%s3847_s11 + $0x198] sm:$0xff] }
  0xbd   : > { %2345 = vmatpush2.bf16.msra.mxu0 %v4854_v34  ;;  %v688_v4 = vadd.f32 %v687_v44, %v686_v47  ;;  %v700_v8 = vadd.f32 %v699_v19, %v698_v38  ;;  %v712_v51 = vadd.f32 %v711_v35, %v710_v26  ;;  %v759_v41 = vrot.slane %v758_v33, 2  ;;  %v786_v6 = vld [vmem:[%s3847_s11 + $0x1d8] sm:$0xff] }
  0xbe   : > { %2386 = vmatpush2.bf16.msra.mxu1 %v4855_v22  ;;  %2346 = vmatprep.subr.bf16.mxu0 %v4858_v40  ;;  %v4861_v18 = vcombine.high %v4859_v45, %v4860_v14  ;;  %v677_v24 = vrot.slane %v676_v2, 1  ;;  %v724_v48 = vadd.f32 %v723_v3, %v722_v57  ;;  %v736_v13 = vadd.f32 %v735_v0, %v734_v53 }
  0xbf   : > { %v748_v28 = vadd.f32 %v747_v17, %v746_v27  ;;  %v689_v43 = vrot.slane %v688_v4, 1  ;;  %v701_v58 = vrot.slane %v700_v8, 1  ;;  %v713_v7 = vrot.slane %v712_v51, 1 }
  0xc0   : > { %2387 = vmatprep.subr.bf16.mxu1 %v4861_v18  ;;  %v760_v42 = vadd.f32 %v759_v41, %v758_v33  ;;  %v4862_v49 = vcombine.low %v4856_v63, %v4857_v39  ;;  %v678_v11 = vadd.f32 %v677_v24, %v676_v2  ;;  %v725_v50 = vrot.slane %v724_v48, 1 }
  0xc1   : > { %v737_v31 = vrot.slane %v736_v13, 1  ;;  %v749_v32 = vrot.slane %v748_v28, 1  ;;  %v4863_v60 = vcombine.low %v4859_v45, %v4860_v14  ;;  %v690_v62 = vadd.f32 %v689_v43, %v688_v4 }
  0xc2   : > { %2347 = vmatpush2.bf16.msra.mxu0 %v4862_v49  ;;  %v702_v15 = vadd.f32 %v701_v58, %v700_v8  ;;  %v714_v16 = vadd.f32 %v713_v7, %v712_v51  ;;  %v761_v61 = vrot.slane %v760_v42, 1  ;;  %v726_v46 = vadd.f32 %v725_v50, %v724_v48 }
  0xc3   : > { %2388 = vmatpush2.bf16.msra.mxu1 %v4863_v60  ;;  %v738_v47 = vadd.f32 %v737_v31, %v736_v13  ;;  %v750_v38 = vadd.f32 %v749_v32, %v748_v28  ;;  %v4294_v26 = vadd.f32 %v678_v11, %v4213_v23  ;;  %v4297_v29 = vadd.f32 %v690_v62, %v4216_v12 }
  0xc4   : > { %v762_v36 = vadd.f32 %v761_v61, %v760_v42  ;;  %v4300_v57 = vadd.f32 %v702_v15, %v4219_v55  ;;  %v4303_v53 = vadd.f32 %v714_v16, %v4222_v54  ;;  %v4306_v27 = vadd.f32 %v726_v46, %v4228_v59  ;;  %v915_v46 = vld [vmem:[%s3847_s11 + $0x20] sm:$0xff] }
  0xc5   : > { %v4309_v44 = vadd.f32 %v738_v47, %v4231_v52  ;;  %v4312_v19 = vadd.f32 %v750_v38, %v4234_v30  ;;  %v790_v23 = vunpack.c.h.bf16 %v780_v1  ;;  %v792_v12 = vunpack.c.h.bf16 %v781_v21  ;;  %v916_v47 = vld [vmem:[%s3847_s11 + $0x60] sm:$0xff] }
  0xc6   : > { %v4315_v35 = vadd.f32 %v762_v36, %v4243_v37  ;;  %v794_v33 = vunpack.c.h.bf16 %v782_v9  ;;  %v796_v55 = vunpack.c.h.bf16 %v783_v10  ;;  %v798_v34 = vunpack.c.h.bf16 %v784_v56 }
  0xc7   : > { %v800_v2 = vunpack.c.h.bf16 %v785_v5  ;;  %v802_v54 = vunpack.c.h.bf16 %v786_v6  ;;  %v809_v59 = vrot.slane %v788_v20, 4  ;;  %v821_v3 = vrot.slane %v790_v23, 4 }
  0xc8   : > { %v833_v0 = vrot.slane %v792_v12, 4  ;;  %v845_v52 = vrot.slane %v794_v33, 4  ;;  %v857_v17 = vrot.slane %v796_v55, 4  ;;  %v869_v22 = vrot.slane %v798_v34, 4 }
  0xc9   : > { %v810_v30 = vadd.f32 %v809_v59, %v788_v20  ;;  %v881_v63 = vrot.slane %v800_v2, 4  ;;  %v893_v37 = vrot.slane %v802_v54, 4  ;;  %v822_v39 = vadd.f32 %v821_v3, %v790_v23 }
  0xca   : > { %v834_v40 = vadd.f32 %v833_v0, %v792_v12  ;;  %v846_v4 = vadd.f32 %v845_v52, %v794_v33  ;;  %v858_v8 = vadd.f32 %v857_v17, %v796_v55  ;;  %v870_v41 = vadd.f32 %v869_v22, %v798_v34  ;;  %v917_v33 = vld [vmem:[%s3847_s11 + $0xa0] sm:$0xff] }
  0xcb   : > { %v811_v51 = vrot.slane %v810_v30, 2  ;;  %v882_v45 = vadd.f32 %v881_v63, %v800_v2  ;;  %v894_v14 = vadd.f32 %v893_v37, %v802_v54  ;;  %v823_v18 = vrot.slane %v822_v39, 2  ;;  %v918_v55 = vld [vmem:[%s3847_s11 + $0xe0] sm:$0xff] }
  0xcc   : > { %v835_v24 = vrot.slane %v834_v40, 2  ;;  %v847_v48 = vrot.slane %v846_v4, 2  ;;  %v859_v13 = vrot.slane %v858_v8, 2  ;;  %v871_v43 = vrot.slane %v870_v41, 2  ;;  %v919_v34 = vld [vmem:[%s3847_s11 + $0x120] sm:$0xff] }
  0xcd   : > { %v812_v28 = vadd.f32 %v811_v51, %v810_v30  ;;  %v883_v58 = vrot.slane %v882_v45, 2  ;;  %v895_v25 = vrot.slane %v894_v14, 2  ;;  %v824_v20 = vadd.f32 %v823_v18, %v822_v39  ;;  %v920_v0 = vld [vmem:[%s3847_s11 + $0x160] sm:$0xff] }
  0xce   : > { %v836_v7 = vadd.f32 %v835_v24, %v834_v40  ;;  %v848_v42 = vadd.f32 %v847_v48, %v846_v4  ;;  %v860_v1 = vadd.f32 %v859_v13, %v858_v8  ;;  %v872_v11 = vadd.f32 %v871_v43, %v870_v41  ;;  %v921_v52 = vld [vmem:[%s3847_s11 + $0x1a0] sm:$0xff] }
  0xcf   : > { %v813_v49 = vrot.slane %v812_v28, 1  ;;  %v884_v50 = vadd.f32 %v883_v58, %v882_v45  ;;  %v896_v31 = vadd.f32 %v895_v25, %v894_v14  ;;  %v825_v32 = vrot.slane %v824_v20, 1  ;;  %v922_v17 = vld [vmem:[%s3847_s11 + $0x1e0] sm:$0xff] }
  0xd0   : > { %v837_v21 = vrot.slane %v836_v7, 1  ;;  %v849_v9 = vrot.slane %v848_v42, 1  ;;  %v861_v10 = vrot.slane %v860_v1, 1  ;;  %v873_v62 = vrot.slane %v872_v11, 1 }
  0xd1   : > { %v814_v60 = vadd.f32 %v813_v49, %v812_v28  ;;  %v885_v15 = vrot.slane %v884_v50, 1  ;;  %v897_v16 = vrot.slane %v896_v31, 1  ;;  %v826_v61 = vadd.f32 %v825_v32, %v824_v20 }
  0xd2   : > { %v838_v56 = vadd.f32 %v837_v21, %v836_v7  ;;  %v850_v5 = vadd.f32 %v849_v9, %v848_v42  ;;  %v862_v6 = vadd.f32 %v861_v10, %v860_v1  ;;  %v874_v38 = vadd.f32 %v873_v62, %v872_v11 }
  0xd3   : > { %v886_v36 = vadd.f32 %v885_v15, %v884_v50  ;;  %v898_v23 = vadd.f32 %v897_v16, %v896_v31  ;;  %v4324_v12 = vadd.f32 %v814_v60, %v4294_v26  ;;  %v4330_v2 = vadd.f32 %v826_v61, %v4297_v29 }
  0xd4   : > { %v4333_v54 = vadd.f32 %v838_v56, %v4300_v57  ;;  %v4336_v59 = vadd.f32 %v850_v5, %v4303_v53  ;;  %v4339_v3 = vadd.f32 %v862_v6, %v4306_v27  ;;  %v4345_v26 = vadd.f32 %v874_v38, %v4309_v44 }
  0xd5   : > { %v4348_v30 = vadd.f32 %v886_v36, %v4312_v19  ;;  %v4351_v29 = vadd.f32 %v898_v23, %v4315_v35  ;;  %v924_v57 = vunpack.c.h.bf16 %v915_v46  ;;  %v926_v22 = vunpack.c.h.bf16 %v916_v47 }
  0xd6   : > { %v928_v63 = vunpack.c.h.bf16 %v917_v33  ;;  %v930_v53 = vunpack.c.h.bf16 %v918_v55  ;;  %v932_v37 = vunpack.c.h.bf16 %v919_v34  ;;  %v934_v39 = vunpack.c.h.bf16 %v920_v0  ;;  %v1051_v0 = vld [vmem:[%s3847_s11 + $0x28] sm:$0xff] }
  0xd7   : > { %v936_v27 = vunpack.c.h.bf16 %v921_v52  ;;  %v938_v40 = vunpack.c.h.bf16 %v922_v17  ;;  %v945_v4 = vrot.slane %v924_v57, 4  ;;  %v957_v8 = vrot.slane %v926_v22, 4  ;;  %v1052_v52 = vld [vmem:[%s3847_s11 + $0x68] sm:$0xff] }
  0xd8   : > { %v969_v51 = vrot.slane %v928_v63, 4  ;;  %v981_v41 = vrot.slane %v930_v53, 4  ;;  %v993_v44 = vrot.slane %v932_v37, 4  ;;  %v1005_v14 = vrot.slane %v934_v39, 4 }
  0xd9   : > { %v946_v45 = vadd.f32 %v945_v4, %v924_v57  ;;  %v1017_v19 = vrot.slane %v936_v27, 4  ;;  %v1029_v18 = vrot.slane %v938_v40, 4  ;;  %v958_v24 = vadd.f32 %v957_v8, %v926_v22 }
  0xda   : > { %v970_v35 = vadd.f32 %v969_v51, %v928_v63  ;;  %v982_v48 = vadd.f32 %v981_v41, %v930_v53  ;;  %v994_v13 = vadd.f32 %v993_v44, %v932_v37  ;;  %v1006_v43 = vadd.f32 %v1005_v14, %v934_v39  ;;  %v1053_v53 = vld [vmem:[%s3847_s11 + $0xa8] sm:$0xff] }
  0xdb   : > { %v947_v28 = vrot.slane %v946_v45, 2  ;;  %v1018_v58 = vadd.f32 %v1017_v19, %v936_v27  ;;  %v1030_v25 = vadd.f32 %v1029_v18, %v938_v40  ;;  %v959_v20 = vrot.slane %v958_v24, 2  ;;  %v1054_v37 = vld [vmem:[%s3847_s11 + $0xe8] sm:$0xff] }
  0xdc   : > { %v971_v7 = vrot.slane %v970_v35, 2  ;;  %v983_v42 = vrot.slane %v982_v48, 2  ;;  %v995_v1 = vrot.slane %v994_v13, 2  ;;  %v1007_v11 = vrot.slane %v1006_v43, 2  ;;  %v1055_v39 = vld [vmem:[%s3847_s11 + $0x128] sm:$0xff] }
  0xdd   : > { %v948_v49 = vadd.f32 %v947_v28, %v946_v45  ;;  %v1019_v50 = vrot.slane %v1018_v58, 2  ;;  %v1031_v31 = vrot.slane %v1030_v25, 2  ;;  %v960_v32 = vadd.f32 %v959_v20, %v958_v24  ;;  %v1056_v51 = vld [vmem:[%s3847_s11 + $0x168] sm:$0xff] }
  0xde   : > { %v972_v21 = vadd.f32 %v971_v7, %v970_v35  ;;  %v984_v9 = vadd.f32 %v983_v42, %v982_v48  ;;  %v996_v10 = vadd.f32 %v995_v1, %v994_v13  ;;  %v1008_v62 = vadd.f32 %v1007_v11, %v1006_v43  ;;  %v1057_v41 = vld [vmem:[%s3847_s11 + $0x1a8] sm:$0xff] }
  0xdf   : > { %v949_v60 = vrot.slane %v948_v49, 1  ;;  %v1020_v15 = vadd.f32 %v1019_v50, %v1018_v58  ;;  %v1032_v16 = vadd.f32 %v1031_v31, %v1030_v25  ;;  %v961_v61 = vrot.slane %v960_v32, 1  ;;  %v1058_v44 = vld [vmem:[%s3847_s11 + $0x1e8] sm:$0xff] }
  0xe0   : > { %v973_v56 = vrot.slane %v972_v21, 1  ;;  %v985_v5 = vrot.slane %v984_v9, 1  ;;  %v997_v6 = vrot.slane %v996_v10, 1  ;;  %v1009_v47 = vrot.slane %v1008_v62, 1 }
  0xe1   : > { %v950_v46 = vadd.f32 %v949_v60, %v948_v49  ;;  %v1021_v38 = vrot.slane %v1020_v15, 1  ;;  %v1033_v36 = vrot.slane %v1032_v16, 1  ;;  %v962_v23 = vadd.f32 %v961_v61, %v960_v32 }
  0xe2   : > { %v974_v33 = vadd.f32 %v973_v56, %v972_v21  ;;  %v986_v55 = vadd.f32 %v985_v5, %v984_v9  ;;  %v998_v34 = vadd.f32 %v997_v6, %v996_v10  ;;  %v1010_v17 = vadd.f32 %v1009_v47, %v1008_v62 }
  0xe3   : > { %v1022_v57 = vadd.f32 %v1021_v38, %v1020_v15  ;;  %v1034_v22 = vadd.f32 %v1033_v36, %v1032_v16  ;;  %v4356_v63 = vadd.f32 %v950_v46, %v4324_v12  ;;  %v4362_v27 = vadd.f32 %v962_v23, %v4330_v2 }
  0xe4   : > { %v4365_v40 = vadd.f32 %v974_v33, %v4333_v54  ;;  %v4368_v4 = vadd.f32 %v986_v55, %v4336_v59  ;;  %v4371_v8 = vadd.f32 %v998_v34, %v4339_v3  ;;  %v4377_v12 = vadd.f32 %v1010_v17, %v4345_v26 }
  0xe5   : > { %v4380_v45 = vadd.f32 %v1022_v57, %v4348_v30  ;;  %v4383_v2 = vadd.f32 %v1034_v22, %v4351_v29  ;;  %v1060_v54 = vunpack.c.h.bf16 %v1051_v0  ;;  %v1062_v14 = vunpack.c.h.bf16 %v1052_v52 }
  0xe6   : > { %v1064_v19 = vunpack.c.h.bf16 %v1053_v53  ;;  %v1066_v59 = vunpack.c.h.bf16 %v1054_v37  ;;  %v1068_v18 = vunpack.c.h.bf16 %v1055_v39  ;;  %v1070_v24 = vunpack.c.h.bf16 %v1056_v51  ;;  %v1187_v51 = vld [vmem:[%s3847_s11 + $0x30] sm:$0xff] }
  0xe7   : > { %v1072_v3 = vunpack.c.h.bf16 %v1057_v41  ;;  %v1074_v35 = vunpack.c.h.bf16 %v1058_v44  ;;  %v1081_v48 = vrot.slane %v1060_v54, 4  ;;  %v1093_v13 = vrot.slane %v1062_v14, 4  ;;  %v1188_v41 = vld [vmem:[%s3847_s11 + $0x70] sm:$0xff] }
  0xe8   : > { %v1105_v28 = vrot.slane %v1064_v19, 4  ;;  %v1117_v43 = vrot.slane %v1066_v59, 4  ;;  %v1129_v26 = vrot.slane %v1068_v18, 4  ;;  %v1141_v25 = vrot.slane %v1070_v24, 4 }
  0xe9   : > { %v1082_v58 = vadd.f32 %v1081_v48, %v1060_v54  ;;  %v1153_v30 = vrot.slane %v1072_v3, 4  ;;  %v1165_v20 = vrot.slane %v1074_v35, 4  ;;  %v1094_v7 = vadd.f32 %v1093_v13, %v1062_v14 }
  0xea   : > { %v1106_v29 = vadd.f32 %v1105_v28, %v1064_v19  ;;  %v1118_v42 = vadd.f32 %v1117_v43, %v1066_v59  ;;  %v1130_v1 = vadd.f32 %v1129_v26, %v1068_v18  ;;  %v1142_v11 = vadd.f32 %v1141_v25, %v1070_v24  ;;  %v1189_v59 = vld [vmem:[%s3847_s11 + $0xb0] sm:$0xff] }
  0xeb   : > { %v1083_v49 = vrot.slane %v1082_v58, 2  ;;  %v1154_v50 = vadd.f32 %v1153_v30, %v1072_v3  ;;  %v1166_v31 = vadd.f32 %v1165_v20, %v1074_v35  ;;  %v1095_v32 = vrot.slane %v1094_v7, 2  ;;  %v1190_v18 = vld [vmem:[%s3847_s11 + $0xf0] sm:$0xff] }
  0xec   : > { %v1107_v21 = vrot.slane %v1106_v29, 2  ;;  %v1119_v9 = vrot.slane %v1118_v42, 2  ;;  %v1131_v10 = vrot.slane %v1130_v1, 2  ;;  %v1143_v62 = vrot.slane %v1142_v11, 2  ;;  %v1191_v24 = vld [vmem:[%s3847_s11 + $0x130] sm:$0xff] }
  0xed   : > { %v1084_v60 = vadd.f32 %v1083_v49, %v1082_v58  ;;  %v1155_v15 = vrot.slane %v1154_v50, 2  ;;  %v1167_v16 = vrot.slane %v1166_v31, 2  ;;  %v1096_v61 = vadd.f32 %v1095_v32, %v1094_v7  ;;  %v1192_v28 = vld [vmem:[%s3847_s11 + $0x170] sm:$0xff] }
  0xee   : > { %v1108_v56 = vadd.f32 %v1107_v21, %v1106_v29  ;;  %v1120_v5 = vadd.f32 %v1119_v9, %v1118_v42  ;;  %v1132_v6 = vadd.f32 %v1131_v10, %v1130_v1  ;;  %v1144_v47 = vadd.f32 %v1143_v62, %v1142_v11  ;;  %v1193_v43 = vld [vmem:[%s3847_s11 + $0x1b0] sm:$0xff] }
  0xef   : > { %v1085_v46 = vrot.slane %v1084_v60, 1  ;;  %v1156_v38 = vadd.f32 %v1155_v15, %v1154_v50  ;;  %v1168_v36 = vadd.f32 %v1167_v16, %v1166_v31  ;;  %v1097_v23 = vrot.slane %v1096_v61, 1  ;;  %v1194_v26 = vld [vmem:[%s3847_s11 + $0x1f0] sm:$0xff] }
  0xf0   : > { %v1109_v33 = vrot.slane %v1108_v56, 1  ;;  %v1121_v55 = vrot.slane %v1120_v5, 1  ;;  %v1133_v34 = vrot.slane %v1132_v6, 1  ;;  %v1145_v52 = vrot.slane %v1144_v47, 1 }
  0xf1   : > { %v1086_v0 = vadd.f32 %v1085_v46, %v1084_v60  ;;  %v1157_v17 = vrot.slane %v1156_v38, 1  ;;  %v1169_v57 = vrot.slane %v1168_v36, 1  ;;  %v1098_v22 = vadd.f32 %v1097_v23, %v1096_v61 }
  0xf2   : > { %v1110_v53 = vadd.f32 %v1109_v33, %v1108_v56  ;;  %v1122_v37 = vadd.f32 %v1121_v55, %v1120_v5  ;;  %v1134_v39 = vadd.f32 %v1133_v34, %v1132_v6  ;;  %v1146_v44 = vadd.f32 %v1145_v52, %v1144_v47 }
  0xf3   : > { %v1158_v54 = vadd.f32 %v1157_v17, %v1156_v38  ;;  %v1170_v14 = vadd.f32 %v1169_v57, %v1168_v36  ;;  %v4388_v19 = vadd.f32 %v1086_v0, %v4356_v63  ;;  %v4394_v3 = vadd.f32 %v1098_v22, %v4362_v27 }
  0xf4   : > { %v4397_v35 = vadd.f32 %v1110_v53, %v4365_v40  ;;  %v4400_v48 = vadd.f32 %v1122_v37, %v4368_v4  ;;  %v4403_v13 = vadd.f32 %v1134_v39, %v4371_v8  ;;  %v4409_v63 = vadd.f32 %v1146_v44, %v4377_v12 }
  0xf5   : > { %v4412_v58 = vadd.f32 %v1158_v54, %v4380_v45  ;;  %v4415_v27 = vadd.f32 %v1170_v14, %v4383_v2  ;;  %v1196_v40 = vunpack.c.h.bf16 %v1187_v51  ;;  %v1198_v25 = vunpack.c.h.bf16 %v1188_v41 }
  0xf6   : > { %v1200_v30 = vunpack.c.h.bf16 %v1189_v59  ;;  %v1202_v4 = vunpack.c.h.bf16 %v1190_v18  ;;  %v1204_v20 = vunpack.c.h.bf16 %v1191_v24  ;;  %v1206_v7 = vunpack.c.h.bf16 %v1192_v28  ;;  %v1323_v28 = vld [vmem:[%s3847_s11 + $0x38] sm:$0xff] }
  0xf7   : > { %v1208_v8 = vunpack.c.h.bf16 %v1193_v43  ;;  %v1210_v29 = vunpack.c.h.bf16 %v1194_v26  ;;  %v1217_v42 = vrot.slane %v1196_v40, 4  ;;  %v1229_v1 = vrot.slane %v1198_v25, 4  ;;  %v1324_v43 = vld [vmem:[%s3847_s11 + $0x78] sm:$0xff] }
  0xf8   : > { %v1241_v49 = vrot.slane %v1200_v30, 4  ;;  %v1253_v11 = vrot.slane %v1202_v4, 4  ;;  %v1265_v12 = vrot.slane %v1204_v20, 4  ;;  %v1277_v31 = vrot.slane %v1206_v7, 4 }
  0xf9   : > { %v1218_v50 = vadd.f32 %v1217_v42, %v1196_v40  ;;  %v1289_v45 = vrot.slane %v1208_v8, 4  ;;  %v1301_v32 = vrot.slane %v1210_v29, 4  ;;  %v1230_v21 = vadd.f32 %v1229_v1, %v1198_v25 }
  0xfa   : > { %v1242_v2 = vadd.f32 %v1241_v49, %v1200_v30  ;;  %v1254_v9 = vadd.f32 %v1253_v11, %v1202_v4  ;;  %v1266_v10 = vadd.f32 %v1265_v12, %v1204_v20  ;;  %v1278_v62 = vadd.f32 %v1277_v31, %v1206_v7  ;;  %v1325_v4 = vld [vmem:[%s3847_s11 + $0xb8] sm:$0xff] }
  0xfb   : > { %v1219_v60 = vrot.slane %v1218_v50, 2  ;;  %v1290_v15 = vadd.f32 %v1289_v45, %v1208_v8  ;;  %v1302_v16 = vadd.f32 %v1301_v32, %v1210_v29  ;;  %v1231_v61 = vrot.slane %v1230_v21, 2  ;;  %v1326_v20 = vld [vmem:[%s3847_s11 + $0xf8] sm:$0xff] }
  0xfc   : > { %v1243_v56 = vrot.slane %v1242_v2, 2  ;;  %v1255_v5 = vrot.slane %v1254_v9, 2  ;;  %v1267_v6 = vrot.slane %v1266_v10, 2  ;;  %v1279_v47 = vrot.slane %v1278_v62, 2  ;;  %v1327_v7 = vld [vmem:[%s3847_s11 + $0x138] sm:$0xff] }
  0xfd   : > { %v1220_v46 = vadd.f32 %v1219_v60, %v1218_v50  ;;  %v1291_v38 = vrot.slane %v1290_v15, 2  ;;  %v1303_v36 = vrot.slane %v1302_v16, 2  ;;  %v1232_v23 = vadd.f32 %v1231_v61, %v1230_v21  ;;  %v1328_v49 = vld [vmem:[%s3847_s11 + $0x178] sm:$0xff] }
  0xfe   : > { %v1244_v33 = vadd.f32 %v1243_v56, %v1242_v2  ;;  %v1256_v55 = vadd.f32 %v1255_v5, %v1254_v9  ;;  %v1268_v34 = vadd.f32 %v1267_v6, %v1266_v10  ;;  %v1280_v52 = vadd.f32 %v1279_v47, %v1278_v62  ;;  %v1329_v11 = vld [vmem:[%s3847_s11 + $0x1b8] sm:$0xff] }
  0xff   : > { %v1221_v0 = vrot.slane %v1220_v46, 1  ;;  %v1292_v17 = vadd.f32 %v1291_v38, %v1290_v15  ;;  %v1304_v57 = vadd.f32 %v1303_v36, %v1302_v16  ;;  %v1233_v22 = vrot.slane %v1232_v23, 1  ;;  %v1330_v12 = vld [vmem:[%s3847_s11 + $0x1f8] sm:$0xff] }
 0x100   : > { %v1245_v53 = vrot.slane %v1244_v33, 1  ;;  %v1257_v37 = vrot.slane %v1256_v55, 1  ;;  %v1269_v39 = vrot.slane %v1268_v34, 1  ;;  %v1281_v41 = vrot.slane %v1280_v52, 1 }
 0x101   : > { %v1222_v51 = vadd.f32 %v1221_v0, %v1220_v46  ;;  %v1293_v44 = vrot.slane %v1292_v17, 1  ;;  %v1305_v54 = vrot.slane %v1304_v57, 1  ;;  %v1234_v14 = vadd.f32 %v1233_v22, %v1232_v23 }
 0x102   : > { %v1246_v59 = vadd.f32 %v1245_v53, %v1244_v33  ;;  %v1258_v18 = vadd.f32 %v1257_v37, %v1256_v55  ;;  %v1270_v24 = vadd.f32 %v1269_v39, %v1268_v34  ;;  %v1282_v26 = vadd.f32 %v1281_v41, %v1280_v52 }
 0x103   : > { %v1294_v40 = vadd.f32 %v1293_v44, %v1292_v17  ;;  %v1306_v25 = vadd.f32 %v1305_v54, %v1304_v57  ;;  %v4420_v30 = vadd.f32 %v1222_v51, %v4388_v19  ;;  %v4426_v8 = vadd.f32 %v1234_v14, %v4394_v3 }
 0x104   : > { %v4429_v29 = vadd.f32 %v1246_v59, %v4397_v35  ;;  %v4432_v42 = vadd.f32 %v1258_v18, %v4400_v48  ;;  %v4435_v1 = vadd.f32 %v1270_v24, %v4403_v13  ;;  %v4441_v19 = vadd.f32 %v1282_v26, %v4409_v63 }
 0x105   : > { %v4444_v50 = vadd.f32 %v1294_v40, %v4412_v58  ;;  %v4447_v3 = vadd.f32 %v1306_v25, %v4415_v27  ;;  %v1332_v35 = vunpack.c.h.bf16 %v1323_v28  ;;  %v1334_v31 = vunpack.c.h.bf16 %v1324_v43 }
 0x106   : > { %v1336_v45 = vunpack.c.h.bf16 %v1325_v4  ;;  %v1338_v48 = vunpack.c.h.bf16 %v1326_v20  ;;  %v1340_v32 = vunpack.c.h.bf16 %v1327_v7  ;;  %v1342_v21 = vunpack.c.h.bf16 %v1328_v49 }
 0x107   : > { %v1344_v13 = vunpack.c.h.bf16 %v1329_v11  ;;  %v1346_v2 = vunpack.c.h.bf16 %v1330_v12  ;;  %v1353_v9 = vrot.slane %v1332_v35, 4  ;;  %v1365_v10 = vrot.slane %v1334_v31, 4 }
 0x108   : > { %v1377_v60 = vrot.slane %v1336_v45, 4  ;;  %v1389_v62 = vrot.slane %v1338_v48, 4  ;;  %v1401_v63 = vrot.slane %v1340_v32, 4  ;;  %v1413_v16 = vrot.slane %v1342_v21, 4 }
 0x109   : > { %v1354_v15 = vadd.f32 %v1353_v9, %v1332_v35  ;;  %v1425_v58 = vrot.slane %v1344_v13, 4  ;;  %v1437_v61 = vrot.slane %v1346_v2, 4  ;;  %v1366_v56 = vadd.f32 %v1365_v10, %v1334_v31 }
 0x10a   : > { %v1378_v27 = vadd.f32 %v1377_v60, %v1336_v45  ;;  %v1390_v5 = vadd.f32 %v1389_v62, %v1338_v48  ;;  %v1402_v6 = vadd.f32 %v1401_v63, %v1340_v32  ;;  %v1414_v47 = vadd.f32 %v1413_v16, %v1342_v21 }
 0x10b   : > { %v1355_v46 = vrot.slane %v1354_v15, 2  ;;  %v1426_v38 = vadd.f32 %v1425_v58, %v1344_v13  ;;  %v1438_v36 = vadd.f32 %v1437_v61, %v1346_v2  ;;  %v1367_v23 = vrot.slane %v1366_v56, 2 }
 0x10c   : > { %v1379_v33 = vrot.slane %v1378_v27, 2  ;;  %v1391_v55 = vrot.slane %v1390_v5, 2  ;;  %v1403_v34 = vrot.slane %v1402_v6, 2  ;;  %v1415_v52 = vrot.slane %v1414_v47, 2 }
 0x10d   : > { %v1356_v0 = vadd.f32 %v1355_v46, %v1354_v15  ;;  %v1427_v17 = vrot.slane %v1426_v38, 2  ;;  %v1439_v57 = vrot.slane %v1438_v36, 2  ;;  %v1368_v22 = vadd.f32 %v1367_v23, %v1366_v56  ;;  %v3405_v23 = vld [vmem:[%s3847_s11 + $0x40] sm:$0xff] }
 0x10e   : > { %v1380_v53 = vadd.f32 %v1379_v33, %v1378_v27  ;;  %v1392_v37 = vadd.f32 %v1391_v55, %v1390_v5  ;;  %v1404_v39 = vadd.f32 %v1403_v34, %v1402_v6  ;;  %v1416_v41 = vadd.f32 %v1415_v52, %v1414_v47  ;;  %v3406_v34 = vld [vmem:[%s3847_s11 + $0x80] sm:$0xff] }
 0x10f   : > { %v1357_v51 = vrot.slane %v1356_v0, 1  ;;  %v1428_v44 = vadd.f32 %v1427_v17, %v1426_v38  ;;  %v1440_v54 = vadd.f32 %v1439_v57, %v1438_v36  ;;  %v1369_v14 = vrot.slane %v1368_v22, 1  ;;  %v3407_v52 = vld [vmem:[%s3847_s11 + $0xc0] sm:$0xff] }
 0x110   : > { %v1381_v59 = vrot.slane %v1380_v53, 1  ;;  %v1393_v18 = vrot.slane %v1392_v37, 1  ;;  %v1405_v24 = vrot.slane %v1404_v39, 1  ;;  %v1417_v43 = vrot.slane %v1416_v41, 1  ;;  %v3408_v57 = vld [vmem:[%s3847_s11 + $0x100] sm:$0xff] }
 0x111   : > { %v1358_v28 = vadd.f32 %v1357_v51, %v1356_v0  ;;  %v1429_v26 = vrot.slane %v1428_v44, 1  ;;  %v1441_v40 = vrot.slane %v1440_v54, 1  ;;  %v1370_v25 = vadd.f32 %v1369_v14, %v1368_v22  ;;  %v3410_v51 = vld [vmem:[%s3847_s11 + $0x180] sm:$0xff] }
 0x112   : > { %v1382_v4 = vadd.f32 %v1381_v59, %v1380_v53  ;;  %v1394_v20 = vadd.f32 %v1393_v18, %v1392_v37  ;;  %v1406_v7 = vadd.f32 %v1405_v24, %v1404_v39  ;;  %v1418_v49 = vadd.f32 %v1417_v43, %v1416_v41  ;;  %v3409_v37 = vld [vmem:[%s3847_s11 + $0x140] sm:$0xff]  ;;  %v4864_v59 = vld [vmem:[#allocation20_spill] sm:$0xff] }
 0x113   : > { %v1430_v11 = vadd.f32 %v1429_v26, %v1428_v44  ;;  %v1442_v12 = vadd.f32 %v1441_v40, %v1440_v54  ;;  %v1444_v35 = vadd.f32 %v1358_v28, %v4420_v30  ;;  %v1446_v31 = vadd.f32 %v1370_v25, %v4426_v8  ;;  %v3411_v44 = vld [vmem:[%s3847_s11 + $0x1c0] sm:$0xff] }
 0x114   : > { %v1448_v45 = vadd.f32 %v1382_v4, %v4429_v29  ;;  %v1450_v48 = vadd.f32 %v1394_v20, %v4432_v42  ;;  %v1452_v32 = vadd.f32 %v1406_v7, %v4435_v1  ;;  %v1454_v21 = vadd.f32 %v1418_v49, %v4441_v19 }
 0x115   : > { %v1456_v13 = vadd.f32 %v1430_v11, %v4444_v50  ;;  %v1458_v2 = vadd.f32 %v1442_v12, %v4447_v3  ;;  %v1460_v9 = vmul.f32 0.015625, %v1444_v35  ;;  %v1462_v10 = vmul.f32 0.015625, %v1446_v31 }
 0x116   : > { %v1464_v60 = vmul.f32 0.015625, %v1448_v45  ;;  %v1466_v62 = vmul.f32 0.015625, %v1450_v48  ;;  %v1468_v63 = vmul.f32 0.015625, %v1452_v32  ;;  %v1470_v30 = vmul.f32 0.015625, %v1454_v21 }
 0x117   : > { %v1472_v15 = vmul.f32 0.015625, %v1456_v13  ;;  %v1474_v8 = vmul.f32 0.015625, %v1458_v2  ;;  %v1476_v16 = vpack.c.bf16 %v1460_v9, %v1460_v9  ;;  %v1478_v29 = vpack.c.bf16 %v1462_v10, %v1462_v10 }
 0x118   : > { %v1480_v58 = vpack.c.bf16 %v1464_v60, %v1464_v60  ;;  %v1482_v42 = vpack.c.bf16 %v1466_v62, %v1466_v62  ;;  %v1484_v61 = vpack.c.bf16 %v1468_v63, %v1468_v63  ;;  %v1486_v1 = vpack.c.bf16 %v1470_v30, %v1470_v30 }
 0x119   : > { %v1488_v56 = vpack.c.bf16 %v1472_v15, %v1472_v15  ;;  %v1490_v19 = vpack.c.bf16 %v1474_v8, %v1474_v8  ;;  %v1636_v27 = vunpack.c.l.b16 %v1476_v16  ;;  %v1638_v50 = vunpack.c.l.b16 %v1478_v29 }
 0x11a   : > { %v1640_v3 = vunpack.c.l.b16 %v1480_v58  ;;  %v1642_v5 = vunpack.c.l.b16 %v1482_v42  ;;  %v1644_v6 = vunpack.c.l.b16 %v1484_v61  ;;  %v1646_v46 = vunpack.c.l.b16 %v1486_v1 }
 0x11b   : > { %v1648_v47 = vunpack.c.l.b16 %v1488_v56  ;;  %v1650_v38 = vunpack.c.l.b16 %v1490_v19  ;;  %v1665_v36 = vsel %vm1651_vm0, %v1638_v50, %v1636_v27  ;;  %v381_v33 = vunpack.c.l.bf16 %v3405_v23 }
 0x11c   : > { %v1666_v55 = vsel %vm1653_vm1, %v1640_v3, %v1665_v36  ;;  %v383_v0 = vunpack.c.l.bf16 %v3406_v34  ;;  %v385_v17 = vunpack.c.l.bf16 %v3407_v52  ;;  %v387_v22 = vunpack.c.l.bf16 %v3408_v57 }
 0x11d   : > { %v1667_v53 = vsel %vm1655_vm2, %v1642_v5, %v1666_v55  ;;  %v389_v39 = vunpack.c.l.bf16 %v3409_v37  ;;  %v391_v41 = vunpack.c.l.bf16 %v3410_v51  ;;  %v393_v54 = vunpack.c.l.bf16 %v3411_v44 }
 0x11e   : > { %v1668_v14 = vsel %vm1657_vm3, %v1644_v6, %v1667_v53  ;;  %v4865_v18 = vunpack.c.l.bf16 %v4864_v59  ;;  %v407_v28 = vrot.slane %v381_v33, 4  ;;  %v419_v43 = vrot.slane %v383_v0, 4 }
 0x11f   : > { %v1669_v26 = vsel %vm1659_vm4, %v1646_v46, %v1668_v14  ;;  %v431_v40 = vrot.slane %v385_v17, 4  ;;  %v443_v25 = vrot.slane %v387_v22, 4  ;;  %v455_v4 = vrot.slane %v389_v39, 4 }
 0x120   : > { %v395_v24 = vrot.slane %v4865_v18, 4  ;;  %v1670_v20 = vsel %vm1661_vm5, %v1648_v47, %v1669_v26  ;;  %v4866_v7 = vmov %v4865_v18  ;;  %v408_v11 = vadd.f32 %v407_v28, %v381_v33  ;;  %v3418_v18 = vld [vmem:[%s3847_s11 + $0x188] sm:$0xff] }
 0x121   : > { %v420_v12 = vadd.f32 %v419_v43, %v383_v0  ;;  %v1671_v35 = vsel %vm1663_vm6, %v1650_v38, %v1670_v20  ;;  %v432_v31 = vadd.f32 %v431_v40, %v385_v17  ;;  %v444_v45 = vadd.f32 %v443_v25, %v387_v22  ;;  %v3412_v0 = vld [vmem:[%s3847_s11 + $0x8] sm:$0xff] }
 0x122   : > { %v396_v49 = vadd.f32 %v395_v24, %v4866_v7  ;;  %v456_v48 = vadd.f32 %v455_v4, %v389_v39  ;;  %v4475_v32 = vpack.c.b16 %v1671_v35, %v1671_v35  ;;  %v409_v13 = vrot.slane %v408_v11, 2  ;;  %v3413_v17 = vld [vmem:[%s3847_s11 + $0x48] sm:$0xff] }
 0x123   : > { %v421_v2 = vrot.slane %v420_v12, 2  ;;  %v433_v9 = vrot.slane %v432_v31, 2  ;;  %v445_v10 = vrot.slane %v444_v45, 2  ;;  %v467_v62 = vrot.slane %v391_v41, 4  ;;  %v3414_v22 = vld [vmem:[%s3847_s11 + $0x88] sm:$0xff] }
 0x124   : > { %v397_v21 = vrot.slane %v396_v49, 2  ;;  %v457_v60 = vrot.slane %v456_v48, 2  ;;  %2348 = vmatprep.mubr.bf16.mxu0 %v4475_v32  ;;  %2389 = vmatprep.mubr.bf16.mxu1 %v4475_v32  ;;  %v410_v30 = vadd.f32 %v409_v13, %v408_v11  ;;  %v479_v8 = vrot.slane %v393_v54, 4  ;;  %v3415_v39 = vld [vmem:[%s3847_s11 + $0xc8] sm:$0xff] }
 0x125   : > { %v422_v15 = vadd.f32 %v421_v2, %v420_v12  ;;  %v434_v16 = vadd.f32 %v433_v9, %v432_v31  ;;  %v446_v29 = vadd.f32 %v445_v10, %v444_v45  ;;  %v468_v42 = vadd.f32 %v467_v62, %v391_v41  ;;  %v3416_v41 = vld [vmem:[%s3847_s11 + $0x108] sm:$0xff] }
 0x126   : > { %v398_v63 = vadd.f32 %v397_v21, %v396_v49  ;;  %v458_v58 = vadd.f32 %v457_v60, %v456_v48  ;;  %v411_v1 = vrot.slane %v410_v30, 1  ;;  %v480_v19 = vadd.f32 %v479_v8, %v393_v54  ;;  %v3417_v54 = vld [vmem:[%s3847_s11 + $0x148] sm:$0xff] }
 0x127   : > { %v423_v56 = vrot.slane %v422_v15, 1  ;;  %v435_v27 = vrot.slane %v434_v16, 1  ;;  %v447_v50 = vrot.slane %v446_v29, 1  ;;  %v469_v5 = vrot.slane %v468_v42, 2  ;;  %v3419_v28 = vld [vmem:[%s3847_s11 + $0x1c8] sm:$0xff] }
 0x128   : > { %v399_v61 = vrot.slane %v398_v63, 1  ;;  %v459_v3 = vrot.slane %v458_v58, 1  ;;  %v4481_v46 = vadd.f32 %v411_v1, %v410_v30  ;;  %v481_v38 = vrot.slane %v480_v19, 2 }
 0x129   : > { %v4483_v47 = vadd.f32 %v423_v56, %v422_v15  ;;  %v4485_v36 = vadd.f32 %v435_v27, %v434_v16  ;;  %v4487_v23 = vadd.f32 %v447_v50, %v446_v29  ;;  %v470_v55 = vadd.f32 %v469_v5, %v468_v42 }
 0x12a   : > { %v4479_v6 = vadd.f32 %v399_v61, %v398_v63  ;;  %v4489_v33 = vadd.f32 %v459_v3, %v458_v58  ;;  %v482_v34 = vadd.f32 %v481_v38, %v480_v19  ;;  %v515_v52 = vunpack.c.l.bf16 %v3412_v0 }
 0x12b   : > { %v517_v57 = vunpack.c.l.bf16 %v3413_v17  ;;  %v519_v53 = vunpack.c.l.bf16 %v3414_v22  ;;  %v471_v37 = vrot.slane %v470_v55, 1  ;;  %v521_v51 = vunpack.c.l.bf16 %v3415_v39 }
 0x12c   : > { %v523_v44 = vunpack.c.l.bf16 %v3416_v41  ;;  %v525_v14 = vunpack.c.l.bf16 %v3417_v54  ;;  %v483_v59 = vrot.slane %v482_v34, 1  ;;  %v527_v24 = vunpack.c.l.bf16 %v3418_v18 }
 0x12d   : > { %v529_v43 = vunpack.c.l.bf16 %v3419_v28  ;;  %v531_v26 = vrot.slane %v515_v52, 4  ;;  %v472_v40 = vadd.f32 %v471_v37, %v470_v55  ;;  %v543_v25 = vrot.slane %v517_v57, 4  ;;  %v3420_v28 = vld [vmem:[%s3847_s11 + $0x10] sm:$0xff] }
 0x12e   : > { %v555_v4 = vrot.slane %v519_v53, 4  ;;  %v567_v20 = vrot.slane %v521_v51, 4  ;;  %v484_v7 = vadd.f32 %v483_v59, %v482_v34  ;;  %v579_v11 = vrot.slane %v523_v44, 4 }
 0x12f   : > { %v532_v49 = vadd.f32 %v531_v26, %v515_v52  ;;  %v591_v12 = vrot.slane %v525_v14, 4  ;;  %v544_v35 = vadd.f32 %v543_v25, %v517_v57  ;;  %v603_v48 = vrot.slane %v527_v24, 4  ;;  %v3421_v26 = vld [vmem:[%s3847_s11 + $0x50] sm:$0xff] }
 0x130   : > { %v556_v31 = vadd.f32 %v555_v4, %v519_v53  ;;  %v568_v45 = vadd.f32 %v567_v20, %v521_v51  ;;  %v580_v13 = vadd.f32 %v579_v11, %v523_v44  ;;  %v615_v9 = vrot.slane %v529_v43, 4  ;;  %v3422_v25 = vld [vmem:[%s3847_s11 + $0x90] sm:$0xff] }
 0x131   : > { %v533_v21 = vrot.slane %v532_v49, 2  ;;  %v592_v2 = vadd.f32 %v591_v12, %v525_v14  ;;  %v545_v10 = vrot.slane %v544_v35, 2  ;;  %v604_v63 = vadd.f32 %v603_v48, %v527_v24  ;;  %v3424_v11 = vld [vmem:[%s3847_s11 + $0x110] sm:$0xff] }
 0x132   : > { %v557_v60 = vrot.slane %v556_v31, 2  ;;  %v569_v62 = vrot.slane %v568_v45, 2  ;;  %v581_v15 = vrot.slane %v580_v13, 2  ;;  %v616_v16 = vadd.f32 %v615_v9, %v529_v43  ;;  %v3425_v12 = vld [vmem:[%s3847_s11 + $0x150] sm:$0xff] }
 0x133   : > { %v534_v30 = vadd.f32 %v533_v21, %v532_v49  ;;  %v593_v8 = vrot.slane %v592_v2, 2  ;;  %v546_v29 = vadd.f32 %v545_v10, %v544_v35  ;;  %v605_v61 = vrot.slane %v604_v63, 2 }
 0x134   : > { %v558_v58 = vadd.f32 %v557_v60, %v556_v31  ;;  %v570_v42 = vadd.f32 %v569_v62, %v568_v45  ;;  %v582_v56 = vadd.f32 %v581_v15, %v580_v13  ;;  %v617_v27 = vrot.slane %v616_v16, 2  ;;  %v3426_v31 = vld [vmem:[%s3847_s11 + $0x190] sm:$0xff] }
 0x135   : > { %v535_v1 = vrot.slane %v534_v30, 1  ;;  %v594_v19 = vadd.f32 %v593_v8, %v592_v2  ;;  %v547_v50 = vrot.slane %v546_v29, 1  ;;  %v606_v38 = vadd.f32 %v605_v61, %v604_v63  ;;  %v3427_v45 = vld [vmem:[%s3847_s11 + $0x1d0] sm:$0xff] }
 0x136   : > { %v559_v3 = vrot.slane %v558_v58, 1  ;;  %v571_v5 = vrot.slane %v570_v42, 1  ;;  %v583_v34 = vrot.slane %v582_v56, 1  ;;  %v618_v52 = vadd.f32 %v617_v27, %v616_v16 }
 0x137   : > { %v536_v55 = vadd.f32 %v535_v1, %v534_v30  ;;  %v595_v0 = vrot.slane %v594_v19, 1  ;;  %v548_v17 = vadd.f32 %v547_v50, %v546_v29  ;;  %v607_v53 = vrot.slane %v606_v38, 1 }
 0x138   : > { %v560_v57 = vadd.f32 %v559_v3, %v558_v58  ;;  %v572_v22 = vadd.f32 %v571_v5, %v570_v42  ;;  %v584_v37 = vadd.f32 %v583_v34, %v582_v56  ;;  %v619_v51 = vrot.slane %v618_v52, 1 }
 0x139   : > { %v596_v39 = vadd.f32 %v595_v0, %v594_v19  ;;  %v4500_v41 = vadd.f32 %v536_v55, %v4479_v6  ;;  %v608_v44 = vadd.f32 %v607_v53, %v606_v38  ;;  %v4503_v54 = vadd.f32 %v548_v17, %v4481_v46 }
 0x13a   : > { %v4506_v14 = vadd.f32 %v560_v57, %v4483_v47  ;;  %v4509_v59 = vadd.f32 %v572_v22, %v4485_v36  ;;  %v620_v18 = vadd.f32 %v619_v51, %v618_v52  ;;  %v4512_v24 = vadd.f32 %v584_v37, %v4487_v23  ;;  %v3423_v36 = vld [vmem:[%s3847_s11 + $0xd0] sm:$0xff] }
 0x13b   : > { %v4515_v6 = vadd.f32 %v596_v39, %v4489_v33  ;;  %v651_v46 = vunpack.c.l.bf16 %v3420_v28  ;;  %v4518_v43 = vadd.f32 %v608_v44, %v472_v40  ;;  %v653_v47 = vunpack.c.l.bf16 %v3421_v26 }
 0x13c   : > { %v655_v4 = vunpack.c.l.bf16 %v3422_v25  ;;  %v657_v20 = vunpack.c.l.bf16 %v3423_v36  ;;  %v4523_v49 = vadd.f32 %v620_v18, %v484_v7  ;;  %v659_v23 = vunpack.c.l.bf16 %v3424_v11 }
 0x13d   : > { %v661_v35 = vunpack.c.l.bf16 %v3425_v12  ;;  %v663_v33 = vunpack.c.l.bf16 %v3426_v31  ;;  %v665_v48 = vunpack.c.l.bf16 %v3427_v45  ;;  %v667_v21 = vrot.slane %v651_v46, 4 }
 0x13e   : > { %v679_v13 = vrot.slane %v653_v47, 4  ;;  %v691_v40 = vrot.slane %v655_v4, 4  ;;  %v703_v2 = vrot.slane %v657_v20, 4  ;;  %v715_v9 = vrot.slane %v659_v23, 4 }
 0x13f   : > { %v727_v10 = vrot.slane %v661_v35, 4  ;;  %v739_v60 = vrot.slane %v663_v33, 4  ;;  %v668_v62 = vadd.f32 %v667_v21, %v651_v46  ;;  %v751_v7 = vrot.slane %v665_v48, 4  ;;  %v3429_v21 = vld [vmem:[%s3847_s11 + $0x58] sm:$0xff] }
 0x140   : > { %v680_v63 = vadd.f32 %v679_v13, %v653_v47  ;;  %v692_v30 = vadd.f32 %v691_v40, %v655_v4  ;;  %v704_v15 = vadd.f32 %v703_v2, %v657_v20  ;;  %v716_v8 = vadd.f32 %v715_v9, %v659_v23  ;;  %v3431_v2 = vld [vmem:[%s3847_s11 + $0xd8] sm:$0xff] }
 0x141   : > { %v728_v16 = vadd.f32 %v727_v10, %v661_v35  ;;  %v740_v29 = vadd.f32 %v739_v60, %v663_v33  ;;  %v669_v58 = vrot.slane %v668_v62, 2  ;;  %v752_v1 = vadd.f32 %v751_v7, %v665_v48  ;;  %v3432_v9 = vld [vmem:[%s3847_s11 + $0x118] sm:$0xff] }
 0x142   : > { %v681_v42 = vrot.slane %v680_v63, 2  ;;  %v693_v61 = vrot.slane %v692_v30, 2  ;;  %v705_v56 = vrot.slane %v704_v15, 2  ;;  %v717_v19 = vrot.slane %v716_v8, 2  ;;  %v3433_v60 = vld [vmem:[%s3847_s11 + $0x158] sm:$0xff] }
 0x143   : > { %v729_v27 = vrot.slane %v728_v16, 2  ;;  %v741_v50 = vrot.slane %v740_v29, 2  ;;  %v670_v3 = vadd.f32 %v669_v58, %v668_v62  ;;  %v753_v55 = vrot.slane %v752_v1, 2  ;;  %v3434_v62 = vld [vmem:[%s3847_s11 + $0x198] sm:$0xff] }
 0x144   : > { %v682_v5 = vadd.f32 %v681_v42, %v680_v63  ;;  %v694_v38 = vadd.f32 %v693_v61, %v692_v30  ;;  %v706_v34 = vadd.f32 %v705_v56, %v704_v15  ;;  %v718_v0 = vadd.f32 %v717_v19, %v716_v8 }
 0x145   : > { %v730_v52 = vadd.f32 %v729_v27, %v728_v16  ;;  %v742_v17 = vadd.f32 %v741_v50, %v740_v29  ;;  %v671_v57 = vrot.slane %v670_v3, 1  ;;  %v754_v37 = vadd.f32 %v753_v55, %v752_v1 }
 0x146   : > { %v683_v22 = vrot.slane %v682_v5, 1  ;;  %v695_v53 = vrot.slane %v694_v38, 1  ;;  %v707_v39 = vrot.slane %v706_v34, 1  ;;  %v719_v51 = vrot.slane %v718_v0, 1 }
 0x147   : > { %v731_v44 = vrot.slane %v730_v52, 1  ;;  %v743_v18 = vrot.slane %v742_v17, 1  ;;  %v672_v28 = vadd.f32 %v671_v57, %v670_v3  ;;  %v755_v47 = vrot.slane %v754_v37, 1 }
 0x148   : > { %v684_v46 = vadd.f32 %v683_v22, %v682_v5  ;;  %v696_v26 = vadd.f32 %v695_v53, %v694_v38  ;;  %v708_v25 = vadd.f32 %v707_v39, %v706_v34  ;;  %v720_v4 = vadd.f32 %v719_v51, %v718_v0 }
 0x149   : > { %v732_v36 = vadd.f32 %v731_v44, %v730_v52  ;;  %v744_v20 = vadd.f32 %v743_v18, %v742_v17  ;;  %v756_v11 = vadd.f32 %v755_v47, %v754_v37  ;;  %v4530_v23 = vadd.f32 %v672_v28, %v4500_v41 }
 0x14a   : > { %v4533_v12 = vadd.f32 %v684_v46, %v4503_v54  ;;  %v4536_v35 = vadd.f32 %v696_v26, %v4506_v14  ;;  %v4539_v31 = vadd.f32 %v708_v25, %v4509_v59  ;;  %v4542_v33 = vadd.f32 %v720_v4, %v4512_v24  ;;  %v3428_v14 = vld [vmem:[%s3847_s11 + $0x18] sm:$0xff] }
 0x14b   : > { %v4545_v45 = vadd.f32 %v732_v36, %v4515_v6  ;;  %v4548_v41 = vadd.f32 %v744_v20, %v4518_v43  ;;  %v4551_v54 = vadd.f32 %v756_v11, %v4523_v49  ;;  %v787_v48 = vunpack.c.l.bf16 %v3428_v14  ;;  %v3430_v59 = vld [vmem:[%s3847_s11 + $0x98] sm:$0xff] }
 0x14c   : > { %v789_v13 = vunpack.c.l.bf16 %v3429_v21  ;;  %v791_v40 = vunpack.c.l.bf16 %v3430_v59  ;;  %v793_v24 = vunpack.c.l.bf16 %v3431_v2  ;;  %v795_v10 = vunpack.c.l.bf16 %v3432_v9  ;;  %v3435_v43 = vld [vmem:[%s3847_s11 + $0x1d8] sm:$0xff] }
 0x14d   : > { %v797_v6 = vunpack.c.l.bf16 %v3433_v60  ;;  %v799_v63 = vunpack.c.l.bf16 %v3434_v62  ;;  %v801_v30 = vunpack.c.l.bf16 %v3435_v43  ;;  %v803_v7 = vrot.slane %v787_v48, 4 }
 0x14e   : > { %v815_v15 = vrot.slane %v789_v13, 4  ;;  %v827_v49 = vrot.slane %v791_v40, 4  ;;  %v839_v8 = vrot.slane %v793_v24, 4  ;;  %v851_v16 = vrot.slane %v795_v10, 4 }
 0x14f   : > { %v863_v29 = vrot.slane %v797_v6, 4  ;;  %v875_v58 = vrot.slane %v799_v63, 4  ;;  %v804_v42 = vadd.f32 %v803_v7, %v787_v48  ;;  %v887_v56 = vrot.slane %v801_v30, 4  ;;  %v3437_v7 = vld [vmem:[%s3847_s11 + $0x60] sm:$0xff] }
 0x150   : > { %v816_v61 = vadd.f32 %v815_v15, %v789_v13  ;;  %v828_v1 = vadd.f32 %v827_v49, %v791_v40  ;;  %v840_v19 = vadd.f32 %v839_v8, %v793_v24  ;;  %v852_v27 = vadd.f32 %v851_v16, %v795_v10  ;;  %v3439_v8 = vld [vmem:[%s3847_s11 + $0xe0] sm:$0xff] }
 0x151   : > { %v864_v50 = vadd.f32 %v863_v29, %v797_v6  ;;  %v876_v3 = vadd.f32 %v875_v58, %v799_v63  ;;  %v805_v5 = vrot.slane %v804_v42, 2  ;;  %v888_v34 = vadd.f32 %v887_v56, %v801_v30  ;;  %v3440_v16 = vld [vmem:[%s3847_s11 + $0x120] sm:$0xff] }
 0x152   : > { %v817_v38 = vrot.slane %v816_v61, 2  ;;  %v829_v55 = vrot.slane %v828_v1, 2  ;;  %v841_v0 = vrot.slane %v840_v19, 2  ;;  %v853_v52 = vrot.slane %v852_v27, 2  ;;  %v3441_v58 = vld [vmem:[%s3847_s11 + $0x160] sm:$0xff] }
 0x153   : > { %v865_v17 = vrot.slane %v864_v50, 2  ;;  %v877_v57 = vrot.slane %v876_v3, 2  ;;  %v806_v22 = vadd.f32 %v805_v5, %v804_v42  ;;  %v889_v39 = vrot.slane %v888_v34, 2  ;;  %v3442_v42 = vld [vmem:[%s3847_s11 + $0x1a0] sm:$0xff] }
 0x154   : > { %v818_v53 = vadd.f32 %v817_v38, %v816_v61  ;;  %v830_v37 = vadd.f32 %v829_v55, %v828_v1  ;;  %v842_v51 = vadd.f32 %v841_v0, %v840_v19  ;;  %v854_v44 = vadd.f32 %v853_v52, %v852_v27 }
 0x155   : > { %v866_v18 = vadd.f32 %v865_v17, %v864_v50  ;;  %v878_v28 = vadd.f32 %v877_v57, %v876_v3  ;;  %v807_v46 = vrot.slane %v806_v22, 1  ;;  %v890_v25 = vadd.f32 %v889_v39, %v888_v34 }
 0x156   : > { %v819_v26 = vrot.slane %v818_v53, 1  ;;  %v831_v47 = vrot.slane %v830_v37, 1  ;;  %v843_v4 = vrot.slane %v842_v51, 1  ;;  %v855_v36 = vrot.slane %v854_v44, 1 }
 0x157   : > { %v867_v20 = vrot.slane %v866_v18, 1  ;;  %v879_v11 = vrot.slane %v878_v28, 1  ;;  %v808_v14 = vadd.f32 %v807_v46, %v806_v22  ;;  %v891_v13 = vrot.slane %v890_v25, 1 }
 0x158   : > { %v820_v48 = vadd.f32 %v819_v26, %v818_v53  ;;  %v832_v21 = vadd.f32 %v831_v47, %v830_v37  ;;  %v844_v59 = vadd.f32 %v843_v4, %v842_v51  ;;  %v856_v40 = vadd.f32 %v855_v36, %v854_v44 }
 0x159   : > { %v868_v2 = vadd.f32 %v867_v20, %v866_v18  ;;  %v880_v24 = vadd.f32 %v879_v11, %v878_v28  ;;  %v892_v9 = vadd.f32 %v891_v13, %v890_v25  ;;  %v4562_v10 = vadd.f32 %v808_v14, %v4530_v23 }
 0x15a   : > { %v4565_v60 = vadd.f32 %v820_v48, %v4533_v12  ;;  %v4568_v6 = vadd.f32 %v832_v21, %v4536_v35  ;;  %v4571_v62 = vadd.f32 %v844_v59, %v4539_v31  ;;  %v4574_v63 = vadd.f32 %v856_v40, %v4542_v33  ;;  %v3436_v35 = vld [vmem:[%s3847_s11 + $0x20] sm:$0xff] }
 0x15b   : > { %v4577_v43 = vadd.f32 %v868_v2, %v4545_v45  ;;  %v4580_v23 = vadd.f32 %v880_v24, %v4548_v41  ;;  %v4583_v12 = vadd.f32 %v892_v9, %v4551_v54  ;;  %v923_v30 = vunpack.c.l.bf16 %v3436_v35  ;;  %v3438_v31 = vld [vmem:[%s3847_s11 + $0xa0] sm:$0xff] }
 0x15c   : > { %v925_v15 = vunpack.c.l.bf16 %v3437_v7  ;;  %v927_v49 = vunpack.c.l.bf16 %v3438_v31  ;;  %v929_v33 = vunpack.c.l.bf16 %v3439_v8  ;;  %v931_v29 = vunpack.c.l.bf16 %v3440_v16  ;;  %v3443_v41 = vld [vmem:[%s3847_s11 + $0x1e0] sm:$0xff] }
 0x15d   : > { %v933_v45 = vunpack.c.l.bf16 %v3441_v58  ;;  %v935_v61 = vunpack.c.l.bf16 %v3442_v42  ;;  %v937_v1 = vunpack.c.l.bf16 %v3443_v41  ;;  %v939_v56 = vrot.slane %v923_v30, 4 }
 0x15e   : > { %v951_v19 = vrot.slane %v925_v15, 4  ;;  %v963_v54 = vrot.slane %v927_v49, 4  ;;  %v975_v27 = vrot.slane %v929_v33, 4  ;;  %v987_v50 = vrot.slane %v931_v29, 4 }
 0x15f   : > { %v999_v3 = vrot.slane %v933_v45, 4  ;;  %v1011_v5 = vrot.slane %v935_v61, 4  ;;  %v940_v38 = vadd.f32 %v939_v56, %v923_v30  ;;  %v1023_v0 = vrot.slane %v937_v1, 4  ;;  %v3445_v56 = vld [vmem:[%s3847_s11 + $0x68] sm:$0xff] }
 0x160   : > { %v952_v55 = vadd.f32 %v951_v19, %v925_v15  ;;  %v964_v34 = vadd.f32 %v963_v54, %v927_v49  ;;  %v976_v52 = vadd.f32 %v975_v27, %v929_v33  ;;  %v988_v17 = vadd.f32 %v987_v50, %v931_v29  ;;  %v3447_v27 = vld [vmem:[%s3847_s11 + $0xe8] sm:$0xff] }
 0x161   : > { %v1000_v57 = vadd.f32 %v999_v3, %v933_v45  ;;  %v1012_v22 = vadd.f32 %v1011_v5, %v935_v61  ;;  %v941_v53 = vrot.slane %v940_v38, 2  ;;  %v1024_v51 = vadd.f32 %v1023_v0, %v937_v1  ;;  %v3448_v50 = vld [vmem:[%s3847_s11 + $0x128] sm:$0xff] }
 0x162   : > { %v953_v37 = vrot.slane %v952_v55, 2  ;;  %v965_v39 = vrot.slane %v964_v34, 2  ;;  %v977_v44 = vrot.slane %v976_v52, 2  ;;  %v989_v18 = vrot.slane %v988_v17, 2  ;;  %v3449_v5 = vld [vmem:[%s3847_s11 + $0x168] sm:$0xff] }
 0x163   : > { %v1001_v28 = vrot.slane %v1000_v57, 2  ;;  %v1013_v46 = vrot.slane %v1012_v22, 2  ;;  %v942_v26 = vadd.f32 %v941_v53, %v940_v38  ;;  %v1025_v4 = vrot.slane %v1024_v51, 2  ;;  %v3450_v38 = vld [vmem:[%s3847_s11 + $0x1a8] sm:$0xff] }
 0x164   : > { %v954_v47 = vadd.f32 %v953_v37, %v952_v55  ;;  %v966_v25 = vadd.f32 %v965_v39, %v964_v34  ;;  %v978_v36 = vadd.f32 %v977_v44, %v976_v52  ;;  %v990_v20 = vadd.f32 %v989_v18, %v988_v17 }
 0x165   : > { %v1002_v11 = vadd.f32 %v1001_v28, %v1000_v57  ;;  %v1014_v14 = vadd.f32 %v1013_v46, %v1012_v22  ;;  %v943_v48 = vrot.slane %v942_v26, 1  ;;  %v1026_v59 = vadd.f32 %v1025_v4, %v1024_v51 }
 0x166   : > { %v955_v21 = vrot.slane %v954_v47, 1  ;;  %v967_v13 = vrot.slane %v966_v25, 1  ;;  %v979_v40 = vrot.slane %v978_v36, 1  ;;  %v991_v2 = vrot.slane %v990_v20, 1 }
 0x167   : > { %v1003_v24 = vrot.slane %v1002_v11, 1  ;;  %v1015_v9 = vrot.slane %v1014_v14, 1  ;;  %v944_v35 = vadd.f32 %v943_v48, %v942_v26  ;;  %v1027_v15 = vrot.slane %v1026_v59, 1 }
 0x168   : > { %v956_v30 = vadd.f32 %v955_v21, %v954_v47  ;;  %v968_v7 = vadd.f32 %v967_v13, %v966_v25  ;;  %v980_v31 = vadd.f32 %v979_v40, %v978_v36  ;;  %v992_v49 = vadd.f32 %v991_v2, %v990_v20 }
 0x169   : > { %v1004_v8 = vadd.f32 %v1003_v24, %v1002_v11  ;;  %v1016_v33 = vadd.f32 %v1015_v9, %v1014_v14  ;;  %v1028_v16 = vadd.f32 %v1027_v15, %v1026_v59  ;;  %v4594_v29 = vadd.f32 %v944_v35, %v4562_v10 }
 0x16a   : > { %v4597_v58 = vadd.f32 %v956_v30, %v4565_v60  ;;  %v4600_v45 = vadd.f32 %v968_v7, %v4568_v6  ;;  %v4603_v42 = vadd.f32 %v980_v31, %v4571_v62  ;;  %v4606_v61 = vadd.f32 %v992_v49, %v4574_v63  ;;  %v3444_v6 = vld [vmem:[%s3847_s11 + $0x28] sm:$0xff] }
 0x16b   : > { %v4609_v41 = vadd.f32 %v1004_v8, %v4577_v43  ;;  %v4612_v10 = vadd.f32 %v1016_v33, %v4580_v23  ;;  %v4615_v60 = vadd.f32 %v1028_v16, %v4583_v12  ;;  %v1059_v1 = vunpack.c.l.bf16 %v3444_v6  ;;  %v3446_v62 = vld [vmem:[%s3847_s11 + $0xa8] sm:$0xff] }
 0x16c   : > { %v1061_v19 = vunpack.c.l.bf16 %v3445_v56  ;;  %v1063_v54 = vunpack.c.l.bf16 %v3446_v62  ;;  %v1065_v63 = vunpack.c.l.bf16 %v3447_v27  ;;  %v1067_v3 = vunpack.c.l.bf16 %v3448_v50  ;;  %v3451_v23 = vld [vmem:[%s3847_s11 + $0x1e8] sm:$0xff] }
 0x16d   : > { %v1069_v43 = vunpack.c.l.bf16 %v3449_v5  ;;  %v1071_v55 = vunpack.c.l.bf16 %v3450_v38  ;;  %v1073_v34 = vunpack.c.l.bf16 %v3451_v23  ;;  %v1075_v0 = vrot.slane %v1059_v1, 4 }
 0x16e   : > { %v1087_v52 = vrot.slane %v1061_v19, 4  ;;  %v1099_v12 = vrot.slane %v1063_v54, 4  ;;  %v1111_v17 = vrot.slane %v1065_v63, 4  ;;  %v1123_v57 = vrot.slane %v1067_v3, 4 }
 0x16f   : > { %v1135_v22 = vrot.slane %v1069_v43, 4  ;;  %v1147_v53 = vrot.slane %v1071_v55, 4  ;;  %v1076_v37 = vadd.f32 %v1075_v0, %v1059_v1  ;;  %v1159_v44 = vrot.slane %v1073_v34, 4  ;;  %v3453_v0 = vld [vmem:[%s3847_s11 + $0x70] sm:$0xff] }
 0x170   : > { %v1088_v39 = vadd.f32 %v1087_v52, %v1061_v19  ;;  %v1100_v51 = vadd.f32 %v1099_v12, %v1063_v54  ;;  %v1112_v18 = vadd.f32 %v1111_v17, %v1065_v63  ;;  %v1124_v28 = vadd.f32 %v1123_v57, %v1067_v3  ;;  %v3455_v17 = vld [vmem:[%s3847_s11 + $0xf0] sm:$0xff] }
 0x171   : > { %v1136_v46 = vadd.f32 %v1135_v22, %v1069_v43  ;;  %v1148_v26 = vadd.f32 %v1147_v53, %v1071_v55  ;;  %v1077_v47 = vrot.slane %v1076_v37, 2  ;;  %v1160_v36 = vadd.f32 %v1159_v44, %v1073_v34  ;;  %v3456_v57 = vld [vmem:[%s3847_s11 + $0x130] sm:$0xff] }
 0x172   : > { %v1089_v25 = vrot.slane %v1088_v39, 2  ;;  %v1101_v4 = vrot.slane %v1100_v51, 2  ;;  %v1113_v20 = vrot.slane %v1112_v18, 2  ;;  %v1125_v11 = vrot.slane %v1124_v28, 2  ;;  %v3457_v53 = vld [vmem:[%s3847_s11 + $0x170] sm:$0xff] }
 0x173   : > { %v1137_v14 = vrot.slane %v1136_v46, 2  ;;  %v1149_v48 = vrot.slane %v1148_v26, 2  ;;  %v1078_v21 = vadd.f32 %v1077_v47, %v1076_v37  ;;  %v1161_v40 = vrot.slane %v1160_v36, 2  ;;  %v3458_v37 = vld [vmem:[%s3847_s11 + $0x1b0] sm:$0xff] }
 0x174   : > { %v1090_v13 = vadd.f32 %v1089_v25, %v1088_v39  ;;  %v1102_v59 = vadd.f32 %v1101_v4, %v1100_v51  ;;  %v1114_v2 = vadd.f32 %v1113_v20, %v1112_v18  ;;  %v1126_v24 = vadd.f32 %v1125_v11, %v1124_v28 }
 0x175   : > { %v1138_v9 = vadd.f32 %v1137_v14, %v1136_v46  ;;  %v1150_v35 = vadd.f32 %v1149_v48, %v1148_v26  ;;  %v1079_v30 = vrot.slane %v1078_v21, 1  ;;  %v1162_v31 = vadd.f32 %v1161_v40, %v1160_v36 }
 0x176   : > { %v1091_v7 = vrot.slane %v1090_v13, 1  ;;  %v1103_v15 = vrot.slane %v1102_v59, 1  ;;  %v1115_v49 = vrot.slane %v1114_v2, 1  ;;  %v1127_v8 = vrot.slane %v1126_v24, 1 }
 0x177   : > { %v1139_v33 = vrot.slane %v1138_v9, 1  ;;  %v1151_v16 = vrot.slane %v1150_v35, 1  ;;  %v1080_v6 = vadd.f32 %v1079_v30, %v1078_v21  ;;  %v1163_v19 = vrot.slane %v1162_v31, 1 }
 0x178   : > { %v1092_v1 = vadd.f32 %v1091_v7, %v1090_v13  ;;  %v1104_v56 = vadd.f32 %v1103_v15, %v1102_v59  ;;  %v1116_v62 = vadd.f32 %v1115_v49, %v1114_v2  ;;  %v1128_v54 = vadd.f32 %v1127_v8, %v1126_v24 }
 0x179   : > { %v1140_v27 = vadd.f32 %v1139_v33, %v1138_v9  ;;  %v1152_v63 = vadd.f32 %v1151_v16, %v1150_v35  ;;  %v1164_v50 = vadd.f32 %v1163_v19, %v1162_v31  ;;  %v4626_v3 = vadd.f32 %v1080_v6, %v4594_v29 }
 0x17a   : > { %v4629_v5 = vadd.f32 %v1092_v1, %v4597_v58  ;;  %v4632_v43 = vadd.f32 %v1104_v56, %v4600_v45  ;;  %v4635_v38 = vadd.f32 %v1116_v62, %v4603_v42  ;;  %v4638_v55 = vadd.f32 %v1128_v54, %v4606_v61  ;;  %v3452_v45 = vld [vmem:[%s3847_s11 + $0x30] sm:$0xff] }
 0x17b   : > { %v4641_v23 = vadd.f32 %v1140_v27, %v4609_v41  ;;  %v4644_v29 = vadd.f32 %v1152_v63, %v4612_v10  ;;  %v4647_v58 = vadd.f32 %v1164_v50, %v4615_v60  ;;  %v1195_v34 = vunpack.c.l.bf16 %v3452_v45  ;;  %v3454_v42 = vld [vmem:[%s3847_s11 + $0xb0] sm:$0xff] }
 0x17c   : > { %v1197_v52 = vunpack.c.l.bf16 %v3453_v0  ;;  %v1199_v12 = vunpack.c.l.bf16 %v3454_v42  ;;  %v1201_v61 = vunpack.c.l.bf16 %v3455_v17  ;;  %v1203_v22 = vunpack.c.l.bf16 %v3456_v57  ;;  %v3459_v10 = vld [vmem:[%s3847_s11 + $0x1f0] sm:$0xff] }
 0x17d   : > { %v1205_v41 = vunpack.c.l.bf16 %v3457_v53  ;;  %v1207_v39 = vunpack.c.l.bf16 %v3458_v37  ;;  %v1209_v51 = vunpack.c.l.bf16 %v3459_v10  ;;  %v1211_v44 = vrot.slane %v1195_v34, 4 }
 0x17e   : > { %v1223_v18 = vrot.slane %v1197_v52, 4  ;;  %v1235_v60 = vrot.slane %v1199_v12, 4  ;;  %v1247_v28 = vrot.slane %v1201_v61, 4  ;;  %v1259_v46 = vrot.slane %v1203_v22, 4 }
 0x17f   : > { %v1271_v26 = vrot.slane %v1205_v41, 4  ;;  %v1283_v47 = vrot.slane %v1207_v39, 4  ;;  %v1212_v25 = vadd.f32 %v1211_v44, %v1195_v34  ;;  %v1295_v20 = vrot.slane %v1209_v51, 4  ;;  %v3461_v44 = vld [vmem:[%s3847_s11 + $0x78] sm:$0xff] }
 0x180   : > { %v1224_v4 = vadd.f32 %v1223_v18, %v1197_v52  ;;  %v1236_v36 = vadd.f32 %v1235_v60, %v1199_v12  ;;  %v1248_v11 = vadd.f32 %v1247_v28, %v1201_v61  ;;  %v1260_v14 = vadd.f32 %v1259_v46, %v1203_v22  ;;  %v3463_v28 = vld [vmem:[%s3847_s11 + $0xf8] sm:$0xff] }
 0x181   : > { %v1272_v48 = vadd.f32 %v1271_v26, %v1205_v41  ;;  %v1284_v21 = vadd.f32 %v1283_v47, %v1207_v39  ;;  %v1213_v13 = vrot.slane %v1212_v25, 2  ;;  %v1296_v2 = vadd.f32 %v1295_v20, %v1209_v51  ;;  %v3464_v46 = vld [vmem:[%s3847_s11 + $0x138] sm:$0xff] }
 0x182   : > { %v1225_v59 = vrot.slane %v1224_v4, 2  ;;  %v1237_v40 = vrot.slane %v1236_v36, 2  ;;  %v1249_v24 = vrot.slane %v1248_v11, 2  ;;  %v1261_v9 = vrot.slane %v1260_v14, 2  ;;  %v3465_v47 = vld [vmem:[%s3847_s11 + $0x178] sm:$0xff] }
 0x183   : > { %v1273_v35 = vrot.slane %v1272_v48, 2  ;;  %v1285_v30 = vrot.slane %v1284_v21, 2  ;;  %v1214_v7 = vadd.f32 %v1213_v13, %v1212_v25  ;;  %v1297_v49 = vrot.slane %v1296_v2, 2  ;;  %v3466_v25 = vld [vmem:[%s3847_s11 + $0x1b8] sm:$0xff] }
 0x184   : > { %v1226_v15 = vadd.f32 %v1225_v59, %v1224_v4  ;;  %v1238_v31 = vadd.f32 %v1237_v40, %v1236_v36  ;;  %v1250_v8 = vadd.f32 %v1249_v24, %v1248_v11  ;;  %v1262_v33 = vadd.f32 %v1261_v9, %v1260_v14 }
 0x185   : > { %v1274_v16 = vadd.f32 %v1273_v35, %v1272_v48  ;;  %v1286_v6 = vadd.f32 %v1285_v30, %v1284_v21  ;;  %v1215_v1 = vrot.slane %v1214_v7, 1  ;;  %v1298_v62 = vadd.f32 %v1297_v49, %v1296_v2 }
 0x186   : > { %v1227_v56 = vrot.slane %v1226_v15, 1  ;;  %v1239_v19 = vrot.slane %v1238_v31, 1  ;;  %v1251_v54 = vrot.slane %v1250_v8, 1  ;;  %v1263_v27 = vrot.slane %v1262_v33, 1 }
 0x187   : > { %v1275_v63 = vrot.slane %v1274_v16, 1  ;;  %v1287_v50 = vrot.slane %v1286_v6, 1  ;;  %v1216_v45 = vadd.f32 %v1215_v1, %v1214_v7  ;;  %v1299_v52 = vrot.slane %v1298_v62, 1 }
 0x188   : > { %v1228_v34 = vadd.f32 %v1227_v56, %v1226_v15  ;;  %v1240_v0 = vadd.f32 %v1239_v19, %v1238_v31  ;;  %v1252_v42 = vadd.f32 %v1251_v54, %v1250_v8  ;;  %v1264_v12 = vadd.f32 %v1263_v27, %v1262_v33 }
 0x189   : > { %v1276_v17 = vadd.f32 %v1275_v63, %v1274_v16  ;;  %v1288_v61 = vadd.f32 %v1287_v50, %v1286_v6  ;;  %v1300_v57 = vadd.f32 %v1299_v52, %v1298_v62  ;;  %v4658_v22 = vadd.f32 %v1216_v45, %v4626_v3 }
 0x18a   : > { %v4661_v53 = vadd.f32 %v1228_v34, %v4629_v5  ;;  %v4664_v41 = vadd.f32 %v1240_v0, %v4632_v43  ;;  %v4667_v37 = vadd.f32 %v1252_v42, %v4635_v38  ;;  %v4670_v39 = vadd.f32 %v1264_v12, %v4638_v55  ;;  %v3460_v43 = vld [vmem:[%s3847_s11 + $0x38] sm:$0xff] }
 0x18b   : > { %v4673_v10 = vadd.f32 %v1276_v17, %v4641_v23  ;;  %v4676_v3 = vadd.f32 %v1288_v61, %v4644_v29  ;;  %v4679_v5 = vadd.f32 %v1300_v57, %v4647_v58  ;;  %v1331_v51 = vunpack.c.l.bf16 %v3460_v43  ;;  %v3462_v38 = vld [vmem:[%s3847_s11 + $0xb8] sm:$0xff] }
 0x18c   : > { %v1333_v18 = vunpack.c.l.bf16 %v3461_v44  ;;  %v1335_v60 = vunpack.c.l.bf16 %v3462_v38  ;;  %v1337_v55 = vunpack.c.l.bf16 %v3463_v28  ;;  %v1339_v26 = vunpack.c.l.bf16 %v3464_v46  ;;  %v3467_v29 = vld [vmem:[%s3847_s11 + $0x1f8] sm:$0xff]  ;;  %s2943_s11 = scalar_lea.sflag [#allocation5], %s3843_s21 }
 0x18d   : > { %v1341_v23 = vunpack.c.l.bf16 %v3465_v47  ;;  %v1343_v4 = vunpack.c.l.bf16 %v3466_v25  ;;  %v1345_v36 = vunpack.c.l.bf16 %v3467_v29  ;;  %v1347_v20 = vrot.slane %v1331_v51, 4 }
 0x18e   : > { %v1359_v11 = vrot.slane %v1333_v18, 4  ;;  %v1371_v58 = vrot.slane %v1335_v60, 4  ;;  %v1383_v14 = vrot.slane %v1337_v55, 4  ;;  %v1395_v48 = vrot.slane %v1339_v26, 4 }
 0x18f   : > { %v1407_v21 = vrot.slane %v1341_v23, 4  ;;  %v1419_v13 = vrot.slane %v1343_v4, 4  ;;  %v1348_v59 = vadd.f32 %v1347_v20, %v1331_v51  ;;  %v1431_v24 = vrot.slane %v1345_v36, 4 }
 0x190   : > { %v1360_v40 = vadd.f32 %v1359_v11, %v1333_v18  ;;  %v1372_v2 = vadd.f32 %v1371_v58, %v1335_v60  ;;  %v1384_v9 = vadd.f32 %v1383_v14, %v1337_v55  ;;  %v1396_v35 = vadd.f32 %v1395_v48, %v1339_v26 }
 0x191   : > { %v1408_v30 = vadd.f32 %v1407_v21, %v1341_v23  ;;  %v1420_v7 = vadd.f32 %v1419_v13, %v1343_v4  ;;  %v1349_v15 = vrot.slane %v1348_v59, 2  ;;  %v1432_v8 = vadd.f32 %v1431_v24, %v1345_v36 }
 0x192   : > { %v1361_v31 = vrot.slane %v1360_v40, 2  ;;  %v1373_v49 = vrot.slane %v1372_v2, 2  ;;  %v1385_v33 = vrot.slane %v1384_v9, 2  ;;  %v1397_v16 = vrot.slane %v1396_v35, 2 }
 0x193   : > { %v1409_v6 = vrot.slane %v1408_v30, 2  ;;  %v1421_v1 = vrot.slane %v1420_v7, 2  ;;  %v1350_v56 = vadd.f32 %v1349_v15, %v1348_v59  ;;  %v1433_v54 = vrot.slane %v1432_v8, 2 }
 0x194   : > { %v1362_v19 = vadd.f32 %v1361_v31, %v1360_v40  ;;  %v1374_v62 = vadd.f32 %v1373_v49, %v1372_v2  ;;  %v1386_v27 = vadd.f32 %v1385_v33, %v1384_v9  ;;  %v1398_v63 = vadd.f32 %v1397_v16, %v1396_v35 }
 0x195   : > { %v1410_v50 = vadd.f32 %v1409_v6, %v1408_v30  ;;  %v1422_v45 = vadd.f32 %v1421_v1, %v1420_v7  ;;  %v1351_v34 = vrot.slane %v1350_v56, 1  ;;  %v1434_v42 = vadd.f32 %v1433_v54, %v1432_v8  ;;  %v1553_v54 = vld [vmem:[#allocation6 + $0x1f0] sm:$0xff] }
 0x196   : > { %v1363_v0 = vrot.slane %v1362_v19, 1  ;;  %v1375_v52 = vrot.slane %v1374_v62, 1  ;;  %v1387_v12 = vrot.slane %v1386_v27, 1  ;;  %v1399_v17 = vrot.slane %v1398_v63, 1 }
 0x197   : > { %v1411_v61 = vrot.slane %v1410_v50, 1  ;;  %v1423_v57 = vrot.slane %v1422_v45, 1  ;;  %v1352_v43 = vadd.f32 %v1351_v34, %v1350_v56  ;;  %v1435_v18 = vrot.slane %v1434_v42, 1  ;;  %v1541_v34 = vld [vmem:[#allocation6 + $0x190] sm:$0xff] }
 0x198   : > { %v1364_v51 = vadd.f32 %v1363_v0, %v1362_v19  ;;  %v1376_v44 = vadd.f32 %v1375_v52, %v1374_v62  ;;  %v1388_v38 = vadd.f32 %v1387_v12, %v1386_v27  ;;  %v1400_v60 = vadd.f32 %v1399_v17, %v1398_v63  ;;  %v1549_v62 = vld [vmem:[#allocation6 + $0x1d0] sm:$0xff]  ;;  %v1550_v27 = vld [vmem:[#allocation6 + $0x1d8] sm:$0xff] }
 0x199   : > { %v1412_v28 = vadd.f32 %v1411_v61, %v1410_v50  ;;  %v1424_v55 = vadd.f32 %v1423_v57, %v1422_v45  ;;  %v1436_v46 = vadd.f32 %v1435_v18, %v1434_v42  ;;  %v1443_v26 = vadd.f32 %v1352_v43, %v4658_v22  ;;  %v1554_v45 = vld [vmem:[#allocation6 + $0x1f8] sm:$0xff]  ;;  %v1545_v0 = vld [vmem:[#allocation6 + $0x1b0] sm:$0xff] }
 0x19a   : > { %v1445_v47 = vadd.f32 %v1364_v51, %v4661_v53  ;;  %v1447_v23 = vadd.f32 %v1376_v44, %v4664_v41  ;;  %v1449_v25 = vadd.f32 %v1388_v38, %v4667_v37  ;;  %v1451_v4 = vadd.f32 %v1400_v60, %v4670_v39  ;;  %v1542_v17 = vld [vmem:[#allocation6 + $0x198] sm:$0xff]  ;;  %v1533_v57 = vld [vmem:[#allocation6 + $0x150] sm:$0xff] }
 0x19b   : > { %v1453_v29 = vadd.f32 %v1412_v28, %v4673_v10  ;;  %v1455_v36 = vadd.f32 %v1424_v55, %v4676_v3  ;;  %v1457_v20 = vadd.f32 %v1436_v46, %v4679_v5  ;;  %v1459_v11 = vmul.f32 0.015625, %v1443_v26  ;;  %v1546_v61 = vld [vmem:[#allocation6 + $0x1b8] sm:$0xff]  ;;  %v1537_v51 = vld [vmem:[#allocation6 + $0x170] sm:$0xff] }
 0x19c   : > { %v1461_v58 = vmul.f32 0.015625, %v1445_v47  ;;  %v1463_v14 = vmul.f32 0.015625, %v1447_v23  ;;  %v1465_v48 = vmul.f32 0.015625, %v1449_v25  ;;  %v1467_v21 = vmul.f32 0.015625, %v1451_v4  ;;  %v1534_v44 = vld [vmem:[#allocation6 + $0x158] sm:$0xff]  ;;  %v1525_v55 = vld [vmem:[#allocation6 + $0x110] sm:$0xff] }
 0x19d   : > { %v1469_v22 = vmul.f32 0.015625, %v1453_v29  ;;  %v1471_v13 = vmul.f32 0.015625, %v1455_v36  ;;  %v1473_v53 = vmul.f32 0.015625, %v1457_v20  ;;  %v1475_v59 = vpack.c.bf16 %v1459_v11, %v1459_v11  ;;  %v1538_v18 = vld [vmem:[#allocation6 + $0x178] sm:$0xff]  ;;  %v1529_v46 = vld [vmem:[#allocation6 + $0x130] sm:$0xff] }
 0x19e   : > { %v1477_v41 = vpack.c.bf16 %v1461_v58, %v1461_v58  ;;  %v1479_v40 = vpack.c.bf16 %v1463_v14, %v1463_v14  ;;  %v1481_v37 = vpack.c.bf16 %v1465_v48, %v1465_v48  ;;  %v1483_v2 = vpack.c.bf16 %v1467_v21, %v1467_v21  ;;  %v1526_v26 = vld [vmem:[#allocation6 + $0x118] sm:$0xff]  ;;  %v1517_v36 = vld [vmem:[#allocation6 + $0xd0] sm:$0xff] }
 0x19f   : > { %v1485_v39 = vpack.c.bf16 %v1469_v22, %v1469_v22  ;;  %v1487_v24 = vpack.c.bf16 %v1471_v13, %v1471_v13  ;;  %v1489_v10 = vpack.c.bf16 %v1473_v53, %v1473_v53  ;;  %v1635_v9 = vunpack.c.l.b16 %v1475_v59  ;;  %v1530_v47 = vld [vmem:[#allocation6 + $0x138] sm:$0xff]  ;;  %v1521_v20 = vld [vmem:[#allocation6 + $0xf0] sm:$0xff] }
 0x1a0   : > { %v1637_v3 = vunpack.c.l.b16 %v1477_v41  ;;  %v1639_v35 = vunpack.c.l.b16 %v1479_v40  ;;  %v1641_v5 = vunpack.c.l.b16 %v1481_v37  ;;  %v1643_v30 = vunpack.c.l.b16 %v1483_v2  ;;  %v1518_v11 = vld [vmem:[#allocation6 + $0xd8] sm:$0xff]  ;;  %v1509_v13 = vld [vmem:[#allocation6 + $0x90] sm:$0xff] }
 0x1a1   : > { %v1645_v7 = vunpack.c.l.b16 %v1485_v39  ;;  %v1647_v31 = vunpack.c.l.b16 %v1487_v24  ;;  %v1649_v8 = vunpack.c.l.b16 %v1489_v10  ;;  %v3131_v63 = vcombine.low %v1549_v62, %v1553_v54  ;;  %v1522_v58 = vld [vmem:[#allocation6 + $0xf8] sm:$0xff]  ;;  %v1513_v53 = vld [vmem:[#allocation6 + $0xb0] sm:$0xff] }
 0x1a2   : > { %v1652_v15 = vsel %vm1651_vm0, %v1637_v3, %v1635_v9  ;;  %v3132_v50 = vcombine.high %v1549_v62, %v1553_v54  ;;  %v3133_v52 = vcombine.low %v1550_v27, %v1554_v45  ;;  %v3134_v42 = vcombine.high %v1550_v27, %v1554_v45  ;;  %v1510_v59 = vld [vmem:[#allocation6 + $0x98] sm:$0xff]  ;;  %v1501_v24 = vld [vmem:[#allocation6 + $0x50] sm:$0xff] }
 0x1a3   : > { %v1654_v49 = vsel %vm1653_vm1, %v1639_v35, %v1652_v15  ;;  %v3124_v12 = vcombine.high %v1541_v34, %v1545_v0  ;;  %v3126_v43 = vcombine.high %v1542_v17, %v1546_v61  ;;  %v3125_v38 = vcombine.low %v1542_v17, %v1546_v61  ;;  %v1514_v41 = vld [vmem:[#allocation6 + $0xb8] sm:$0xff]  ;;  %v1505_v10 = vld [vmem:[#allocation6 + $0x70] sm:$0xff] }
 0x1a4   : > { %v1656_v33 = vsel %vm1655_vm2, %v1641_v5, %v1654_v49  ;;  %2398 = vmatprep.subr.bf16.mxu0 %v3132_v50  ;;  %2439 = vmatprep.subr.bf16.mxu1 %v3134_v42  ;;  %v3116_v60 = vcombine.high %v1533_v57, %v1537_v51  ;;  %v3118_v28 = vcombine.high %v1534_v44, %v1538_v18  ;;  %v1502_v9 = vld [vmem:[#allocation6 + $0x58] sm:$0xff]  ;;  %v1493_v15 = vld [vmem:[#allocation6 + $0x10] sm:$0xff] }
 0x1a5   : > { %v1658_v16 = vsel %vm1657_vm3, %v1643_v30, %v1656_v33  ;;  %v3115_v23 = vcombine.low %v1533_v57, %v1537_v51  ;;  %v3117_v25 = vcombine.low %v1534_v44, %v1538_v18  ;;  %v3108_v4 = vcombine.high %v1525_v55, %v1529_v46  ;;  %v1506_v3 = vld [vmem:[#allocation6 + $0x78] sm:$0xff]  ;;  %v1617_v62 = vld [vmem:[#allocation6 + $0x3f0] sm:$0xff] }
 0x1a6   : > { %v1660_v6 = vsel %vm1659_vm4, %v1645_v7, %v1658_v16  ;;  %v3110_v29 = vcombine.high %v1526_v26, %v1530_v47  ;;  %v3107_v14 = vcombine.low %v1525_v55, %v1529_v46  ;;  %v3109_v48 = vcombine.low %v1526_v26, %v1530_v47  ;;  %v1494_v49 = vld [vmem:[#allocation6 + $0x18] sm:$0xff]  ;;  %v1597_v51 = vld [vmem:[#allocation6 + $0x350] sm:$0xff] }
 0x1a7   : > { %v1662_v1 = vsel %vm1661_vm5, %v1647_v31, %v1660_v6  ;;  %v3100_v21 = vcombine.high %v1517_v36, %v1521_v20  ;;  %v3102_v22 = vcombine.high %v1518_v11, %v1522_v58  ;;  %v3099_v40 = vcombine.low %v1517_v36, %v1521_v20  ;;  %v1497_v31 = vld [vmem:[#allocation6 + $0x30] sm:$0xff]  ;;  %v1614_v54 = vld [vmem:[#allocation6 + $0x3d8] sm:$0xff] }
 0x1a8   : > { %v1664_v56 = vsel %vm1663_vm6, %v1649_v8, %v1662_v1  ;;  %v3101_v37 = vcombine.low %v1518_v11, %v1522_v58  ;;  %v3092_v2 = vcombine.high %v1509_v13, %v1513_v53  ;;  %v3094_v39 = vcombine.high %v1510_v59, %v1514_v41  ;;  %v1498_v8 = vld [vmem:[#allocation6 + $0x38] sm:$0xff]  ;;  %v1601_v44 = vld [vmem:[#allocation6 + $0x370] sm:$0xff] }
 0x1a9   : > { %v4704_v19 = vpack.c.b16 %v1664_v56, %v1664_v56  ;;  %v3091_v35 = vcombine.low %v1509_v13, %v1513_v53  ;;  %v3093_v5 = vcombine.low %v1510_v59, %v1514_v41  ;;  %v3084_v30 = vcombine.high %v1501_v24, %v1505_v10  ;;  %v1613_v56 = vld [vmem:[#allocation6 + $0x3d0] sm:$0xff]  ;;  %v1618_v27 = vld [vmem:[#allocation6 + $0x3f8] sm:$0xff] }
 0x1aa   : > { %v3086_v7 = vcombine.high %v1502_v9, %v1506_v3  ;;  %v3083_v33 = vcombine.low %v1501_v24, %v1505_v10  ;;  %v3085_v16 = vcombine.low %v1502_v9, %v1506_v3  ;;  %v3076_v6 = vcombine.high %v1493_v15, %v1497_v31  ;;  %v1606_v42 = vld [vmem:[#allocation6 + $0x398] sm:$0xff]  ;;  %v1589_v46 = vld [vmem:[#allocation6 + $0x310] sm:$0xff] }
 0x1ab   : > { %2349 = vmatmul.mubr.bf16.vlgmr.msra.gmra.mxu0 %v4704_v19  ;;  %2390 = vmatmul.mubr.bf16.vlgmr.msra.gmra.mxu1 %v4704_v19  ;;  %v3078_v1 = vcombine.high %v1494_v49, %v1498_v8  ;;  %v3077_v50 = vcombine.low %v1494_v49, %v1498_v8  ;;  %v3196_v45 = vcombine.high %v1613_v56, %v1617_v62  ;;  %v1598_v18 = vld [vmem:[#allocation6 + $0x358] sm:$0xff]  ;;  %v1593_v26 = vld [vmem:[#allocation6 + $0x330] sm:$0xff] }
 0x1ac   : > { %2430 = vmatprep.mubr.bf16.mxu0 %v4475_v32  ;;  %2471 = vmatprep.mubr.bf16.mxu1 %v4475_v32  ;;  %v3123_v32 = vcombine.low %v1541_v34, %v1545_v0  ;;  %v3198_v34 = vcombine.high %v1614_v54, %v1618_v27  ;;  %v1605_v0 = vld [vmem:[#allocation6 + $0x390] sm:$0xff]  ;;  %v3195_v17 = vcombine.low %v1613_v56, %v1617_v62  ;;  %v1590_v47 = vld [vmem:[#allocation6 + $0x318] sm:$0xff] }
 0x1ad   : > { %2399 = vmatpush1.bf16.msra.mxu0 %v3131_v63  ;;  %2440 = vmatpush1.bf16.msra.mxu1 %v3133_v52  ;;  %v3075_v63 = vcombine.low %v1493_v15, %v1497_v31  ;;  %v1609_v52 = vld [vmem:[#allocation6 + $0x3b0] sm:$0xff]  ;;  %v3197_v61 = vcombine.low %v1614_v54, %v1618_v27  ;;  %v1582_v58 = vld [vmem:[#allocation6 + $0x2d8] sm:$0xff]  ;;  %v2482_v27 = vlaneseq }
 0x1ae   : > { %2400 = vmatprep.subr.bf16.mxu0 %v3124_v12  ;;  %2441 = vmatprep.subr.bf16.mxu1 %v3126_v43  ;;  %v1610_v12 = vld [vmem:[#allocation6 + $0x3b8] sm:$0xff]  ;;  %v3188_v57 = vcombine.high %v1605_v0, %v1609_v52  ;;  %v1581_v20 = vld [vmem:[#allocation6 + $0x2d0] sm:$0xff] }
 0x1af   : > { %v3190_v43 = vcombine.high %v1606_v42, %v1610_v12  ;;  %v1585_v11 = vld [vmem:[#allocation6 + $0x2f0] sm:$0xff]  ;;  %v1574_v41 = vld [vmem:[#allocation6 + $0x298] sm:$0xff] }
 0x1b0   : > { %v1573_v53 = vld [vmem:[#allocation6 + $0x290] sm:$0xff]  ;;  %v1566_v3 = vld [vmem:[#allocation6 + $0x258] sm:$0xff] }
 0x1b1   : > { %2401 = vmatpush1.bf16.msra.mxu0 %v3123_v32  ;;  %2442 = vmatpush1.bf16.msra.mxu1 %v3125_v38  ;;  %v1602_v32 = vld [vmem:[#allocation6 + $0x378] sm:$0xff]  ;;  %v3187_v38 = vcombine.low %v1605_v0, %v1609_v52  ;;  %v1577_v59 = vld [vmem:[#allocation6 + $0x2b0] sm:$0xff] }
 0x1b2   : > { %2402 = vmatprep.subr.bf16.mxu0 %v3116_v60  ;;  %2443 = vmatprep.subr.bf16.mxu1 %v3118_v28  ;;  %v3189_v60 = vcombine.low %v1606_v42, %v1610_v12  ;;  %v3180_v28 = vcombine.high %v1597_v51, %v1601_v44  ;;  %v3182_v55 = vcombine.high %v1598_v18, %v1602_v32  ;;  %v1565_v10 = vld [vmem:[#allocation6 + $0x250] sm:$0xff]  ;;  %v1558_v8 = vld [vmem:[#allocation6 + $0x218] sm:$0xff] }
 0x1b3   : > { %v1569_v9 = vld [vmem:[#allocation6 + $0x270] sm:$0xff] }
 0x1b4   : > { %v1557_v31 = vld [vmem:[#allocation6 + $0x210] sm:$0xff] }
 0x1b5   : > { %2403 = vmatpush1.bf16.msra.mxu0 %v3115_v23  ;;  %2444 = vmatpush1.bf16.msra.mxu1 %v3117_v25  ;;  %v1594_v23 = vld [vmem:[#allocation6 + $0x338] sm:$0xff]  ;;  %v3179_v25 = vcombine.low %v1597_v51, %v1601_v44  ;;  %v1561_v49 = vld [vmem:[#allocation6 + $0x230] sm:$0xff] }
 0x1b6   : > { %2404 = vmatprep.subr.bf16.mxu0 %v3108_v4  ;;  %2445 = vmatprep.subr.bf16.mxu1 %v3110_v29  ;;  %v3181_v4 = vcombine.low %v1598_v18, %v1602_v32  ;;  %v3172_v29 = vcombine.high %v1589_v46, %v1593_v26  ;;  %v3174_v36 = vcombine.high %v1590_v47, %v1594_v23 }
 0x1b7   : > { %v3139_v62 = vcombine.low %v1557_v31, %v1561_v49 }
 0x1b9   : > { %2405 = vmatpush1.bf16.msra.mxu0 %v3107_v14  ;;  %2446 = vmatpush1.bf16.msra.mxu1 %v3109_v48  ;;  %v1586_v14 = vld [vmem:[#allocation6 + $0x2f8] sm:$0xff]  ;;  %v3171_v48 = vcombine.low %v1589_v46, %v1593_v26 }
 0x1ba   : > { %2406 = vmatprep.subr.bf16.mxu0 %v3100_v21  ;;  %2447 = vmatprep.subr.bf16.mxu1 %v3102_v22  ;;  %v3173_v21 = vcombine.low %v1590_v47, %v1594_v23  ;;  %v3164_v22 = vcombine.high %v1581_v20, %v1585_v11  ;;  %v3166_v13 = vcombine.high %v1582_v58, %v1586_v14 }
 0x1bd   : > { %2407 = vmatpush1.bf16.msra.mxu0 %v3099_v40  ;;  %2448 = vmatpush1.bf16.msra.mxu1 %v3101_v37  ;;  %v1578_v40 = vld [vmem:[#allocation6 + $0x2b8] sm:$0xff]  ;;  %v3163_v37 = vcombine.low %v1581_v20, %v1585_v11 }
 0x1be   : > { %2408 = vmatprep.subr.bf16.mxu0 %v3092_v2  ;;  %2449 = vmatprep.subr.bf16.mxu1 %v3094_v39  ;;  %v3165_v2 = vcombine.low %v1582_v58, %v1586_v14  ;;  %v3156_v39 = vcombine.high %v1573_v53, %v1577_v59  ;;  %v3158_v24 = vcombine.high %v1574_v41, %v1578_v40 }
 0x1c1   : > { %2409 = vmatpush1.bf16.msra.mxu0 %v3091_v35  ;;  %2450 = vmatpush1.bf16.msra.mxu1 %v3093_v5  ;;  %v1570_v35 = vld [vmem:[#allocation6 + $0x278] sm:$0xff]  ;;  %v3155_v5 = vcombine.low %v1573_v53, %v1577_v59  ;;  %v3658_v59 = vmov 0  }
 0x1c2   : > { %2410 = vmatprep.subr.bf16.mxu0 %v3084_v30  ;;  %2451 = vmatprep.subr.bf16.mxu1 %v3086_v7  ;;  %v3157_v30 = vcombine.low %v1574_v41, %v1578_v40  ;;  %v3148_v7 = vcombine.high %v1565_v10, %v1569_v9  ;;  %v3150_v15 = vcombine.high %v1566_v3, %v1570_v35  ;;  %v3369_v41 = vld [vmem:[#allocation9 + $0x78] sm:$0xff]  }
 0x1c3   : > { %3368 = vset.pattern.permute.xlu0 %v3658_v59  ;;  %v3370_v40 = vld [vmem:[#allocation9 + $0xf8] sm:$0xff]  }
 0x1c5   : > { %2411 = vmatpush1.bf16.msra.mxu0 %v3083_v33  ;;  %2452 = vmatpush1.bf16.msra.mxu1 %v3085_v16  ;;  %v1562_v33 = vld [vmem:[#allocation6 + $0x238] sm:$0xff]  ;;  %v3147_v16 = vcombine.low %v1565_v10, %v1569_v9 }
 0x1c6   : > { %2412 = vmatprep.subr.bf16.mxu0 %v3076_v6  ;;  %2453 = vmatprep.subr.bf16.mxu1 %v3078_v1  ;;  %v3149_v6 = vcombine.low %v1566_v3, %v1570_v35  ;;  %v3140_v1 = vcombine.high %v1557_v31, %v1561_v49  ;;  %v3142_v56 = vcombine.high %v1558_v8, %v1562_v33  ;;  %v3375_v10 = vld [vmem:[#allocation9 + $0x30] sm:$0xff]   ;;  %v3377_v3 = vld [vmem:[#allocation9 + $0x68] sm:$0xff]   ;;  %v3383_v31 = vld [vmem:[#allocation9 + $0x20] sm:$0xff]  }
 0x1c7   : > { %v3141_v54 = vcombine.low %v1558_v8, %v1562_v33  ;;  %v3376_v9 = vld [vmem:[#allocation9 + $0xb0] sm:$0xff]   ;;  %v3378_v35 = vld [vmem:[#allocation9 + $0xe8] sm:$0xff]   ;;  %v3384_v49 = vld [vmem:[#allocation9 + $0xa0] sm:$0xff]  }
 0x1c8   : > { %v3385_v8 = vld [vmem:[#allocation9 + $0x58] sm:$0xff]  }
 0x1c9   : > { %2413 = vmatpush1.bf16.msra.mxu0 %v3075_v63  ;;  %2454 = vmatpush1.bf16.msra.mxu1 %v3077_v50  ;;  %v2483_v63 = vshrl.u32 %v2482_v27, 7  ;;  %v3386_v33 = vld [vmem:[#allocation9 + $0xd8] sm:$0xff]  }
 0x1ca   : > { %2414 = vmatprep.subr.bf16.mxu0 %v3196_v45  ;;  %2455 = vmatprep.subr.bf16.mxu1 %v3198_v34  ;;  %v2480_v34 = vld [vmem:[%s4779_s2] sm:$0xf] }
 0x1cb   : > { %v4712_v50 = vsub.s32 0, %v2483_v63  ;;  %v4714_v45 = vsub.s32 2, %v2483_v63  ;;  %v4719_v0 = vsub.s32 1, %v2483_v63  ;;  %v4721_v52 = vsub.s32 3, %v2483_v63 }
 0x1cd   : > { %2415 = vmatpush2.bf16.msra.mxu0 %v3195_v17  ;;  %2456 = vmatpush2.bf16.msra.mxu1 %v3197_v61  ;;  %v2485_v42 = vrot.slane %v2480_v34, %v4712_v50  ;;  %v2493_v12 = vrot.slane %v2480_v34, %v4714_v45  ;;  %v2510_v17 = vld [vmem:[#allocation8] sm:$0xf]  ;;  %v2497_v61 = vrot.slane %v2480_v34, %v4721_v52 }
 0x1ce   : > { %2416 = vmatprep.subr.bf16.mxu0 %v3188_v57  ;;  %2457 = vmatprep.subr.bf16.mxu1 %v3190_v43  ;;  %v2515_v18 = vrot.slane %v2510_v17, %v4712_v50  ;;  %v2523_v32 = vrot.slane %v2510_v17, %v4714_v45  ;;  %v2527_v20 = vrot.slane %v2510_v17, %v4721_v52 }
 0x1d1   : > { %2417 = vmatpush2.bf16.msra.mxu0 %v3187_v38  ;;  %2458 = vmatpush2.bf16.msra.mxu1 %v3189_v60  ;;  %v2519_v60 = vrot.slane %v2510_v17, %v4719_v0 }
 0x1d2   : > { %2418 = vmatprep.subr.bf16.mxu0 %v3180_v28  ;;  %2459 = vmatprep.subr.bf16.mxu1 %v3182_v55 }
 0x1d5   : > { %2419 = vmatpush2.bf16.msra.mxu0 %v3179_v25  ;;  %2460 = vmatpush2.bf16.msra.mxu1 %v3181_v4 }
 0x1d6   : > { %2420 = vmatprep.subr.bf16.mxu0 %v3172_v29  ;;  %2461 = vmatprep.subr.bf16.mxu1 %v3174_v36 }
 0x1d9   : > { %2421 = vmatpush2.bf16.msra.mxu0 %v3171_v48  ;;  %2462 = vmatpush2.bf16.msra.mxu1 %v3173_v21 }
 0x1da   : > { %2422 = vmatprep.subr.bf16.mxu0 %v3164_v22  ;;  %2463 = vmatprep.subr.bf16.mxu1 %v3166_v13 }
 0x1dd   : > { %2423 = vmatpush2.bf16.msra.mxu0 %v3163_v37  ;;  %2464 = vmatpush2.bf16.msra.mxu1 %v3165_v2  ;;  %v3371_v37 = vld [vmem:[#allocation9 + $0x38] sm:$0xff]  }
 0x1de   : > { %2424 = vmatprep.subr.bf16.mxu0 %v3156_v39  ;;  %2465 = vmatprep.subr.bf16.mxu1 %v3158_v24  ;;  %v3372_v2 = vld [vmem:[#allocation9 + $0xb8] sm:$0xff]   ;;  %v3373_v39 = vld [vmem:[#allocation9 + $0x70] sm:$0xff]  }
 0x1df   : > { %v3374_v24 = vld [vmem:[#allocation9 + $0xf0] sm:$0xff]  }
 0x1e1   : > { %2425 = vmatpush2.bf16.msra.mxu0 %v3155_v5  ;;  %2466 = vmatpush2.bf16.msra.mxu1 %v3157_v30  ;;  %v3379_v5 = vld [vmem:[#allocation9 + $0x28] sm:$0xff]  }
 0x1e2   : > { %2426 = vmatprep.subr.bf16.mxu0 %v3148_v7  ;;  %2467 = vmatprep.subr.bf16.mxu1 %v3150_v15  ;;  %v3380_v30 = vld [vmem:[#allocation9 + $0xa8] sm:$0xff]   ;;  %v3381_v7 = vld [vmem:[#allocation9 + $0x60] sm:$0xff]  }
 0x1e3   : > { %v3382_v15 = vld [vmem:[#allocation9 + $0xe0] sm:$0xff]  }
 0x1e5   : > { %2427 = vmatpush2.bf16.msra.mxu0 %v3147_v16  ;;  %2468 = vmatpush2.bf16.msra.mxu1 %v3149_v6  ;;  %v3387_v16 = vld [vmem:[#allocation9 + $0x18] sm:$0xff]  }
 0x1e6   : > { %2428 = vmatprep.subr.bf16.mxu0 %v3140_v1  ;;  %2469 = vmatprep.subr.bf16.mxu1 %v3142_v56  ;;  %v3388_v6 = vld [vmem:[#allocation9 + $0x98] sm:$0xff]   ;;  %v3389_v1 = vld [vmem:[#allocation9 + $0x50] sm:$0xff]  }
 0x1e7   : > { %v3390_v56 = vld [vmem:[#allocation9 + $0xd0] sm:$0xff]  }
 0x1e9   : > { %2429 = vmatpush2.bf16.msra.mxu0 %v3139_v62  ;;  %2470 = vmatpush2.bf16.msra.mxu1 %v3141_v54  ;;  %v3391_v62 = vld [vmem:[#allocation9 + $0x10] sm:$0xff]  }
 0x1ea   : > { %3240 = vmatprep.subr.bf16.mxu0 %v3369_v41  ;;  %3262 = vmatprep.subr.bf16.mxu1 %v3370_v40  ;;  %v3392_v54 = vld [vmem:[#allocation9 + $0x90] sm:$0xff]  }
 0x1ec   : > { %2431 = vmatmul.mubr.bf16.vlgmr.msra.gmra.mxu0 %v4704_v19  ;;  %2472 = vmatmul.mubr.bf16.vlgmr.msra.gmra.mxu1 %v4704_v19  ;;  %v2489_v19 = vrot.slane %v2480_v34, %v4719_v0 }
 0x1ed   : > { %3241 = vmatpush3.bf16.msra.mxu0 %v3371_v37  ;;  %3263 = vmatpush3.bf16.msra.mxu1 %v3372_v2 }
 0x1ee   : > { %3242 = vmatprep.subr.bf16.mxu0 %v3373_v39  ;;  %3264 = vmatprep.subr.bf16.mxu1 %v3374_v24 }
 0x1f1   : > { %3243 = vmatpush3.bf16.msra.mxu0 %v3375_v10  ;;  %3265 = vmatpush3.bf16.msra.mxu1 %v3376_v9  ;;  %v3201_v9 = vld [vmem:[%s4784_s7] ss:$0 sm:$0xff] }
 0x1f2   : > { %3244 = vmatprep.subr.bf16.mxu0 %v3377_v3  ;;  %3266 = vmatprep.subr.bf16.mxu1 %v3378_v35 }
 0x1f5   : > { %3245 = vmatpush3.bf16.msra.mxu0 %v3379_v5  ;;  %3267 = vmatpush3.bf16.msra.mxu1 %v3380_v30 }
 0x1f6   : > { %3246 = vmatprep.subr.bf16.mxu0 %v3381_v7  ;;  %3268 = vmatprep.subr.bf16.mxu1 %v3382_v15 }
 0x1f9   : > { %3247 = vmatpush3.bf16.msra.mxu0 %v3383_v31  ;;  %3269 = vmatpush3.bf16.msra.mxu1 %v3384_v49 }
 0x1fa   : > { %3248 = vmatprep.subr.bf16.mxu0 %v3385_v8  ;;  %3270 = vmatprep.subr.bf16.mxu1 %v3386_v33 }
 0x1fd   : > { %3249 = vmatpush3.bf16.msra.mxu0 %v3387_v16  ;;  %3271 = vmatpush3.bf16.msra.mxu1 %v3388_v6 }
 0x1fe   : > { %3250 = vmatprep.subr.bf16.mxu0 %v3389_v1  ;;  %3272 = vmatprep.subr.bf16.mxu1 %v3390_v56 }
 0x201   : > { %3251 = vmatpush3.bf16.msra.mxu0 %v3391_v62  ;;  %3273 = vmatpush3.bf16.msra.mxu1 %v3392_v54 }
 0x26b   : > { %v2350_v57 = vpop.f32.mrf.mxu0  ;;  %v2391_v43 = vpop.f32.mrf.mxu1 }
 0x26c   : > { %v2502_v51 = vadd.f32 %v2485_v42, %v2350_v57  ;;  %v2504_v44 = vadd.f32 %v2493_v12, %v2391_v43  ;;  %v3199_v12 = vld [vmem:[#allocation2] ss:$0 sm:$0xff] }
 0x26d   : > { %v2352_v38 = vpop.f32.mrf.mxu0  ;;  %v2393_v28 = vpop.f32.mrf.mxu1 }
 0x26e   : > { %v2506_v55 = vmax.f32 %v2502_v51, 0.0  ;;  %v2508_v46 = vmax.f32 %v2504_v44, 0.0  ;;  %v2503_v26 = vadd.f32 %v2489_v19, %v2352_v38  ;;  %v2505_v47 = vadd.f32 %v2497_v61, %v2393_v28  ;;  %v3393_v38 = vld [vmem:[#allocation9 + $0x48] sm:$0xff]  }
 0x26f   : > { %v2354_v23 = vpop.f32.mrf.mxu0  ;;  %v2395_v25 = vpop.f32.mrf.mxu1  ;;  %v3395_v28 = vld [vmem:[#allocation9 + $0x8] sm:$0xff]   ;;  %3252 = vmatprep.subr.bf16.mxu0 %v3393_v38 }
 0x270   : > { %v2507_v4 = vmax.f32 %v2503_v26, 0.0  ;;  %v2532_v11 = vmul.f32 %v2515_v18, %v2506_v55  ;;  %v2534_v58 = vmul.f32 %v2523_v32, %v2508_v46  ;;  %v2509_v48 = vmax.f32 %v2505_v47, 0.0  ;;  %v3396_v55 = vld [vmem:[#allocation9 + $0x88] sm:$0xff]   ;;  %3253 = vmatpush3.bf16.msra.mxu0 %v3395_v28  ;;  %v3397_v26 = vld [vmem:[#allocation9 + $0x40] sm:$0xff]  }
 0x271   : > { %v2355_v29 = vpop.f32.mrf.mxu0  ;;  %v2396_v36 = vpop.f32.mrf.mxu1  ;;  %v3398_v47 = vld [vmem:[#allocation9 + $0xc0] sm:$0xff]   ;;  %3254 = vmatprep.subr.bf16.mxu0 %v3397_v26 }
 0x272   : > { %v2533_v14 = vmul.f32 %v2519_v60, %v2507_v4  ;;  %v2535_v22 = vmul.f32 %v2527_v20, %v2509_v48  ;;  %v3394_v60 = vld [vmem:[#allocation9 + $0xc8] sm:$0xff]   ;;  %v3399_v23 = vld [vmem:[#allocation9] sm:$0xff]   ;;  %v2564_v4 = vld [vmem:[%s4782_s5] sm:$0xf] }
 0x273   : > { %3274 = vmatprep.subr.bf16.mxu1 %v3394_v60  ;;  %v3400_v25 = vld [vmem:[#allocation9 + $0x80] sm:$0xff]   ;;  %v2569_v29 = vrot.slane %v2564_v4, %v4712_v50  ;;  %v2577_v36 = vrot.slane %v2564_v4, %v4714_v45  ;;  %v2573_v20 = vrot.slane %v2564_v4, %v4719_v0 }
 0x274   : > { %v2536_v21 = vadd.f32 %v2533_v14, %v2532_v11  ;;  %3275 = vmatpush3.bf16.msra.mxu1 %v3396_v55  ;;  %3255 = vmatpush3.bf16.msra.mxu0 %v3399_v23  ;;  %v2581_v11 = vrot.slane %v2564_v4, %v4721_v52 }
 0x275   : > { %3276 = vmatprep.subr.bf16.mxu1 %v3398_v47 }
 0x276   : > { %v2537_v13 = vadd.f32 %v2536_v21, %v2534_v58 }
 0x278   : > { %v2538_v53 = vadd.f32 %v2537_v13, %v2535_v22  ;;  %3277 = vmatpush3.bf16.msra.mxu1 %v3400_v25 }
 0x27a   : > { %2539 = vadd.xlane.f32.xlu0 %v2538_v53 }
 0x2ac   : > { %v2432_v27 = vpop.f32.mrf.mxu0  ;;  %v2473_v63 = vpop.f32.mrf.mxu1 }
 0x2ae   : > { %v2434_v34 = vpop.f32.mrf.mxu0  ;;  %v2475_v42 = vpop.f32.mrf.mxu1 }
 0x2b0   : > { %v2436_v17 = vpop.f32.mrf.mxu0  ;;  %v2477_v19 = vpop.f32.mrf.mxu1 }
 0x2b2   : > { %v2437_v57 = vpop.f32.mrf.mxu0  ;;  %v2478_v51 = vpop.f32.mrf.mxu1 }
 0x303   : > { %v2540_v61 = vpop.xlane.xlu0 %2539 }
 0x304   : > { %v2548_v43 = vadd.f32 %v3199_v12, %v2540_v61 }
 0x306   : > { %v3200_v44 = vmul.f32 -1.442695, %v2548_v43 }
 0x308   : > { %3401 = vpow2.f32 %v3200_v44 }
 0x315   : > { %v3402_v18 = vpop.eup %3401 }
 0x316   : > { %v2552_v32 = vadd.f32 1.0, %v3402_v18 }
 0x318   : > { %3403 = vrcp.f32 %v2552_v32 }
 0x325   : > { %v3404_v46 = vpop.eup %3403 }
 0x326   : > { %2557 = vperm.xlu0 %3368, %v3404_v46  }
 0x3a1   : > { %v2558_v58 = vpop.permute.xlu0 %2557 }
 0x3a2   : > { %v2560_v14 = vmul.f32 %v2558_v58, %v2432_v27  ;;  %v2561_v48 = vmul.f32 %v2558_v58, %v2434_v34  ;;  %v2562_v21 = vmul.f32 %v2558_v58, %v2473_v63  ;;  %v2563_v22 = vmul.f32 %v2558_v58, %v2475_v42 }
 0x3a4   : > { %v2586_v13 = vadd.f32 %v2569_v29, %v2560_v14  ;;  %v2588_v53 = vadd.f32 %v2577_v36, %v2562_v21  ;;  %v2587_v59 = vadd.f32 %v2573_v20, %v2561_v48  ;;  %v2589_v41 = vadd.f32 %v2581_v11, %v2563_v22 }
 0x3a6   : > { %v2590_v40 = vmax.f32 %v2586_v13, 0.0  ;;  %v2592_v37 = vmax.f32 %v2588_v53, 0.0  ;;  %v2591_v2 = vmax.f32 %v2587_v59, 0.0  ;;  %v2593_v50 = vmax.f32 %v2589_v41, 0.0 }
 0x3a8   : > { %v2594_v39 = vpack.c.bf16 %v2590_v40, %v2590_v40  ;;  %v2596_v45 = vpack.c.bf16 %v2592_v37, %v2592_v37  ;;  %v2595_v0 = vpack.c.bf16 %v2591_v2, %v2591_v2  ;;  %v2597_v24 = vpack.c.bf16 %v2593_v50, %v2593_v50 }
 0x3aa   : > { %2893 = vmatprep.mubr.bf16.mxu0 %v2595_v0  ;;  %2933 = vmatprep.mubr.bf16.mxu1 %v2597_v24 }
 0x3ab   : > { %2894 = vmatmul.mubr.bf16.vlgmr.msra.gmra.mxu0 %v2594_v39  ;;  %2934 = vmatmul.mubr.bf16.vlgmr.msra.gmra.mxu1 %v2596_v45 }
 0x46b   : > { %v3256_v52 = vpop.f32.mrf.mxu0  ;;  %v3278_v10 = vpop.f32.mrf.mxu1 }
 0x46d   : > { %v3257_v3 = vpop.f32.mrf.mxu0  ;;  %v3279_v35 = vpop.f32.mrf.mxu1 }
 0x46e   : > { %v3258_v5 = vadd.f32 %v3257_v3, %v3256_v52  ;;  %v3280_v31 = vadd.f32 %v3279_v35, %v3278_v10 }
 0x46f   : > { %v3259_v30 = vpop.f32.mrf.mxu0  ;;  %v3281_v7 = vpop.f32.mrf.mxu1 }
 0x470   : > { %v2896_v15 = vadd.f32 %v3258_v5, %v3201_v9 }
 0x471   : > { %v3260_v49 = vpop.f32.mrf.mxu0  ;;  %v3282_v8 = vpop.f32.mrf.mxu1 }
 0x472   : > { %v2936_v33 = vadd.f32 %v3280_v31, %v2896_v15 }
 0x474   : > { %2941 = vst [vmem:[%s368_s24] sm:$0xff] %v2936_v33 }
 0x475   : > { %3587 = shalt.err (!%p3584_p9)
}
 0x476   : > { %s3588_s18 = scalar_lea.hbm %s2954_s28, 128  ;;  %s3592_s20 = scalar_lea.hbm %s4785_s8, 256 }
 0x477   : > { %p3589_p1 = scmp.ne.s32.totalorder %s2954_s28, %s3588_s18  ;;  %p3593_p11 = scmp.lt.s32.totalorder %s2954_s28, %s4785_s8 }
 0x478   : > { %p3594_p13 = scmp.lt.s32.totalorder %s3592_s20, %s3588_s18 }
 0x479   : > { %p3590_p8 = pnand %p3589_p1, %p4867_p6 }
 0x47a   : > { %p3595_p2 = por %p3594_p13, %p3593_p11 }
 0x47b   : > { %p3591_p10 = pneg %p3590_p8 }
 0x47d   : > { %p3596_p4 = pnand %p3595_p2, %p3591_p10 }
 0x47f   : > { %3599 = shalt.err (!%p3596_p4)
}
 0x480   : > { %3298 = dma.vmem_to_hbm [thread:$0]  (%p4867_p6), %s2957_s23, 128, %s2954_s28, %s2943_s11  }
 0x481 PF: > { %s2968_s24 = sand.u32 1, %s3634_s29   ;;  %p4868_p12 = scmp.ne.s32.totalorder %s4802_s13, 0 }
 0x482   : > { %p4869_p0 = scmp.ge.s32.totalorder %s3646_s10, 2  ;;  %s2969_s27 = scalar_lea.sflag [#allocation5], %s2968_s24 }
 0x484   : > { %p3315_p5 = pnand %p4869_p0, %p4868_p12 }
 0x486   : > { %p3316_p3 = pneg %p3315_p5 }
 0x488   : > { %3629 = dma.done.wait (%p3316_p3), %s2969_s27, 128  }
 0x489   : > { %3631 = vsyncadd (%p3316_p3), %s2969_s27, 4294967168  ;;  %p25_p7 = scmp.ge.s32.totalorder %s3788_s22, 4   ;;  %s4870_s29 = smov %s3638_s30 }
 0x48a   : > { %s4871_s30 = smov %s3642_s9  ;;  %s4872_s9 = smov %s3798_s25 }
 0x48b   : > { %s4873_s10 = smov %s3788_s22  ;;  %27 = sbr.rel (!%p25_p7) target bundleno = 10 (0xa), region = 109 }
 0x490   :  { %2974 = vsyncpa [#allocation4], 1 }
 0x491   :  { %2976 = vsyncpa [#allocation4 + $0x1], 1 }
 0x492   :  { %2977 = vsyncpa [#allocation7], 1 }
 0x493   :  { %2978 = vsyncpa [#allocation10], 1 }
 0x494   :  { %2979 = vsyncpa [#allocation5], 1 }
 0x495   :  { %2981 = vsyncpa [#allocation5 + $0x1], 1 }

</bundles_post_ra>
